<compile_context>
chip_gen: v7x
topology: tpu7x:2x2x1
jax: 0.10.0
libtpu: 0.0.40
codegen_flags: <defaults>
</compile_context>

<pallas_src>
import functools

import jax
import jax.numpy as jnp
from jax import lax
from jax.experimental import pallas as pl
from jax.experimental.pallas import tpu as pltpu

LANE = 128
SUBLANE = 8


# --------------------------------------------------------------------------------------
# Sizing helpers
# --------------------------------------------------------------------------------------
def _round_up(x, m):
    return (x + m - 1) // m * m


@functools.lru_cache(maxsize=1)
def _vmem_budget():
    """Return (per-block byte budget, vmem_limit_bytes), generation aware.

    Resident set per grid step ~= 2x input block + 2x output block (double buffered)
    + halo rows + weights/bias, i.e. ~4.5x one block, so the block budget is roughly
    vmem_limit / 5 with headroom.
    """
    try:
        cap = int(pltpu.get_tpu_info().vmem_capacity_bytes)
    except Exception:
        cap = 128 << 20
    if cap <= (64 << 20):               # v7x: 64 MiB VMEM per TensorCore
        return 3 << 20, 48 << 20
    return 7 << 20, 96 << 20            # v5e / v6e: 128 MiB VMEM


def _largest_divisor_leq(n, cap):
    best = 1
    for d in range(1, n + 1):
        if n % d == 0 and d <= cap:
            best = d
    return best


def _pick_whole_tiles(batch, n_tok, c_pad, itemsize, budget):
    """Channel tile (multiple of 128 dividing c_pad) and batch tile (divisor of B)."""
    n128 = c_pad // LANE
    tc = LANE
    for m in range(1, n128 + 1):
        if n128 % m == 0 and n_tok * m * LANE * itemsize <= budget:
            tc = m * LANE
    tb = 1
    for d in range(1, batch + 1):
        if batch % d == 0 and d * n_tok * tc * itemsize <= budget:
            tb = d
    return tb, tc


def _col_index(tok, width):
    """Column index of flattened tokens; bitwise-and for power-of-two widths."""
    if width & (width - 1) == 0:
        return jnp.bitwise_and(tok, width - 1)
    return lax.rem(tok, width)


# --------------------------------------------------------------------------------------
# Kernel bodies
# --------------------------------------------------------------------------------------
def _dwconv_whole_kernel(x_ref, w_ref, b_ref, o_ref, *, width):
    """Whole-feature-map block.

    x_ref: (TB, N, TC)  N = H*W tokens on sublanes, TC channels on lanes
    w_ref: (3, 3, TC)   per-channel taps (already in compute dtype)
    b_ref: (1, 1, TC)   bias
    o_ref: (TB, N, TC)
    """
    cdt = w_ref.dtype
    n = x_ref.shape[1]

    # Edge-validity masks from an in-kernel iota (transient vregs, no DMA).
    tok = lax.broadcasted_iota(jnp.int32, (n, 1), 0)
    col = _col_index(tok, width)
    m_l = (col != 0).astype(cdt)             # left neighbour exists
    m_r = (col != width - 1).astype(cdt)     # right neighbour exists
    m_u = (tok >= width).astype(cdt)         # row above exists
    m_d = (tok < n - width).astype(cdt)      # row below exists

    wt = [[w_ref[i, j, :] for j in range(3)] for i in range(3)]
    bias = b_ref[0, 0, :]

    for tb in range(x_ref.shape[0]):          # static unroll over the batch block
        x = x_ref[tb].astype(cdt)             # (N, TC)
        # Horizontal neighbours: XLU sublane rolls + wrap-around masking.
        x_l = pltpu.roll(x, 1, axis=0) * m_l          # x at (h, w-1)
        x_r = pltpu.roll(x, n - 1, axis=0) * m_r      # x at (h, w+1)
        t0 = x_l * wt[0][0] + x * wt[0][1] + x_r * wt[0][2]
        t1 = x_l * wt[1][0] + x * wt[1][1] + x_r * wt[1][2]
        t2 = x_l * wt[2][0] + x * wt[2][1] + x_r * wt[2][2]
        # Vertical combination: out[s] = t0[s-W] + t1[s] + t2[s+W], edges masked.
        acc = t1 + bias
        acc = acc + pltpu.roll(t0, width % n, axis=0) * m_u
        acc = acc + pltpu.roll(t2, (n - width) % n, axis=0) * m_d
        o_ref[tb] = acc.astype(o_ref.dtype)


def _dwconv_tiled_kernel(xc_ref, xu_ref, xd_ref, w_ref, b_ref, o_ref, *,
                         width, tile_rows):
    """Row-tiled block with one halo row above/below (requires W % 8 == 0).

    xc_ref: (1, TH*W, TC) centre tile      xu_ref/xd_ref: (1, W, TC) halo rows
    w_ref:  (3, 3, TC)                     b_ref: (1, 1, TC)
    o_ref:  (1, TH*W, TC)
    """
    cdt = w_ref.dtype
    n = xc_ref.shape[1]                       # tile_rows * width
    rt = pl.program_id(1)
    up_ok = (rt > 0).astype(cdt)                               # halo row above is real
    dn_ok = (rt < pl.num_programs(1) - 1).astype(cdt)          # halo row below is real

    col = _col_index(lax.broadcasted_iota(jnp.int32, (n, 1), 0), width)
    m_l = (col != 0).astype(cdt)
    m_r = (col != width - 1).astype(cdt)
    hcol = lax.broadcasted_iota(jnp.int32, (width, 1), 0)       # halo is a single row
    hm_l = (hcol != 0).astype(cdt)
    hm_r = (hcol != width - 1).astype(cdt)

    wt = [[w_ref[i, j, :] for j in range(3)] for i in range(3)]
    bias = b_ref[0, 0, :]

    # Centre tile: horizontal taps via sublane rolls.
    x = xc_ref[0].astype(cdt)
    x_l = pltpu.roll(x, 1, axis=0) * m_l
    x_r = pltpu.roll(x, n - 1, axis=0) * m_r
    t0 = x_l * wt[0][0] + x * wt[0][1] + x_r * wt[0][2]
    t1 = x_l * wt[1][0] + x * wt[1][1] + x_r * wt[1][2]
    t2 = x_l * wt[2][0] + x * wt[2][1] + x_r * wt[2][2]

    # Halo rows: kernel-row-0 taps of the row above, kernel-row-2 taps of the row below.
    hu = xu_ref[0].astype(cdt)
    hu_l = pltpu.roll(hu, 1, axis=0) * hm_l
    hu_r = pltpu.roll(hu, width - 1, axis=0) * hm_r
    t0_up = (hu_l * wt[0][0] + hu * wt[0][1] + hu_r * wt[0][2]) * up_ok

    hd = xd_ref[0].astype(cdt)
    hd_l = pltpu.roll(hd, 1, axis=0) * hm_l
    hd_r = pltpu.roll(hd, width - 1, axis=0) * hm_r
    t2_dn = (hd_l * wt[2][0] + hd * wt[2][1] + hd_r * wt[2][2]) * dn_ok

    # Vertical combination via sublane-aligned concat (W % 8 == 0): no vertical rolls,
    # no up/down mask vmuls.
    acc = t1 + bias
    if tile_rows == 1:
        acc = acc + t0_up + t2_dn
    else:
        acc = acc + jnp.concatenate([t0_up, t0[: n - width]], axis=0)   # row above
        acc = acc + jnp.concatenate([t2[width:], t2_dn], axis=0)        # row below
    o_ref[0] = acc.astype(o_ref.dtype)


# --------------------------------------------------------------------------------------
# Wrapper
# --------------------------------------------------------------------------------------
def torch_dwconv_weight_to_hwc(weight_c133):
    """PyTorch Conv2d(dim, dim, 3, groups=dim) weight (C, 1, 3, 3) -> (3, 3, C)."""
    return jnp.transpose(weight_c133[:, 0, :, :], (1, 2, 0))


@functools.partial(jax.jit, static_argnames=("H", "W", "row_block"))
def dwconv_pallas(x_bnc, weight_33c, bias_c, *, H, W, row_block=None):
    """Depthwise 3x3 conv (stride 1, pad 1, bias) on token-major input.

    x_bnc:      (B, N, C) with N == H*W
    weight_33c: (3, 3, C)  (use torch_dwconv_weight_to_hwc for PyTorch weights)
    bias_c:     (C,)
    row_block:  optional forced rows-per-tile (testing / tuning); must divide H, W % 8 == 0.
    returns     (B, N, C)
    """
    B, N, C = x_bnc.shape
    assert N == H * W, (N, H, W)
    in_dtype = x_bnc.dtype
    itemsize = jnp.dtype(in_dtype).itemsize

    # bf16 compute path (v6e/v7x have bf16 VALUs); everything else computes in f32.
    # TODO(synk): on v5e (no bf16 VPU) force f32 compute even for bf16 inputs.
    if jnp.dtype(in_dtype) == jnp.dtype(jnp.bfloat16):
        cdt = jnp.bfloat16
    else:
        cdt = jnp.float32

    # Lane-dense layout: pad channels to a multiple of 128 so every store is an unmasked vst.
    # (The pad and the final [..., :C] slice are XLA copies; carry C_pad through the model to
    #  avoid them if this op is on the critical path.)
    c_pad = _round_up(C, LANE)
    pad = c_pad - C
    if pad:
        x_bnc = jnp.pad(x_bnc, ((0, 0), (0, 0), (0, pad)))
        weight_33c = jnp.pad(weight_33c, ((0, 0), (0, 0), (0, pad)))
        bias_c = jnp.pad(bias_c, ((0, pad),))
    w = weight_33c.astype(cdt)                        # cast once, outside the kernel
    b = bias_c.reshape(1, 1, c_pad).astype(cdt)

    budget, vmem_limit = _vmem_budget()
    cost = pl.CostEstimate(
        flops=22 * B * N * c_pad,
        transcendentals=0,
        bytes_accessed=(2 * B * N * c_pad + 10 * c_pad) * itemsize)

    use_tiled = (row_block is not None) or (
        N * LANE * itemsize > budget and W % SUBLANE == 0 and H > 1)

    if use_tiled:
        # ---- row-tiled path: TH rows per block + 1 halo row above/below ----
        if row_block is not None:
            th = int(row_block)
        else:
            cap_rows = max(budget // (W * LANE * itemsize), 1)
            th = _largest_divisor_leq(H, cap_rows)
        assert H % th == 0 and W % SUBLANE == 0, (H, th, W)
        tc = LANE
        n_rt = H // th
        n_ct = c_pad // tc

        center_map = lambda bi, ri, ci: (bi, ri, ci)
        up_map = lambda bi, ri, ci: (bi, jnp.maximum(ri * th - 1, 0), ci)
        down_map = lambda bi, ri, ci: (bi, jnp.minimum(ri * th + th, H - 1), ci)

        out = pl.pallas_call(
            functools.partial(_dwconv_tiled_kernel, width=W, tile_rows=th),
            out_shape=jax.ShapeDtypeStruct((B, N, c_pad), in_dtype),
            grid_spec=pltpu.PrefetchScalarGridSpec(
                num_scalar_prefetch=0,
                grid=(B, n_rt, n_ct),
                in_specs=[
                    pl.BlockSpec((1, th * W, tc), center_map),
                    pl.BlockSpec((1, W, tc), up_map),       # halo row above (clamped+masked)
                    pl.BlockSpec((1, W, tc), down_map),     # halo row below (clamped+masked)
                    pl.BlockSpec((3, 3, tc), lambda bi, ri, ci: (0, 0, ci)),
                    pl.BlockSpec((1, 1, tc), lambda bi, ri, ci: (0, 0, ci)),
                ],
                out_specs=pl.BlockSpec((1, th * W, tc), center_map),
            ),
            compiler_params=pltpu.CompilerParams(
                dimension_semantics=("parallel", "parallel", "parallel"),
                vmem_limit_bytes=vmem_limit),
            cost_estimate=cost,
        )(x_bnc, x_bnc, x_bnc, w, b)
    else:
        # ---- whole-map path: whole H*W token axis per block, TB batches per block ----
        tb, tc = _pick_whole_tiles(B, N, c_pad, itemsize, budget)
        block_bytes = tb * N * tc * itemsize
        if 4 * block_bytes + (4 << 20) > vmem_limit:
            # TODO(synk): very large feature map with W % 8 != 0 -> no aligned halo tiling;
            # bump the limit and rely on the compiler (may spill on v7x).
            vmem_limit = min(int(4.5 * block_bytes) + (8 << 20), 112 << 20)

        out = pl.pallas_call(
            functools.partial(_dwconv_whole_kernel, width=W),
            out_shape=jax.ShapeDtypeStruct((B, N, c_pad), in_dtype),
            grid_spec=pltpu.PrefetchScalarGridSpec(
                num_scalar_prefetch=0,
                grid=(B // tb, c_pad // tc),
                in_specs=[
                    pl.BlockSpec((tb, N, tc), lambda bi, ci: (bi, 0, ci)),
                    pl.BlockSpec((3, 3, tc), lambda bi, ci: (0, 0, ci)),
                    pl.BlockSpec((1, 1, tc), lambda bi, ci: (0, 0, ci)),
                ],
                out_specs=pl.BlockSpec((tb, N, tc), lambda bi, ci: (bi, 0, ci)),
            ),
            compiler_params=pltpu.CompilerParams(
                dimension_semantics=("parallel", "parallel"),
                vmem_limit_bytes=vmem_limit),
            cost_estimate=cost,
        )(x_bnc, w, b)

    if pad:
        out = out[..., :C]
    return out


# --------------------------------------------------------------------------------------
# Reference & self-test
# --------------------------------------------------------------------------------------
def dwconv_reference(x_bnc, weight_c133, bias_c, H, W):
    """Pure-JAX reference taking the PyTorch weight layout (C, 1, 3, 3)."""
    B, N, C = x_bnc.shape
    x_nhwc = x_bnc.reshape(B, H, W, C)
    w_hwio = jnp.transpose(weight_c133, (2, 3, 1, 0))   # (3, 3, 1, C)
    y = lax.conv_general_dilated(
        x_nhwc, w_hwio,
        window_strides=(1, 1), padding=((1, 1), (1, 1)),
        dimension_numbers=("NHWC", "HWIO", "NHWC"),
        feature_group_count=C)
    y = y + bias_c.reshape(1, 1, 1, C)
    return y.reshape(B, N, C)


if __name__ == "__main__":
    def run_case(name, key, B, C, Hs, Ws, dtype=jnp.float32, row_block=None,
                 atol=1e-4, rtol=1e-4):
        N = Hs * Ws
        kx, kw, kb = jax.random.split(key, 3)
        x = jax.random.normal(kx, (B, N, C), dtype=jnp.float32)
        weight_torch = jax.random.normal(kw, (C, 1, 3, 3), dtype=jnp.float32) * 0.1
        bias = jax.random.normal(kb, (C,), dtype=jnp.float32) * 0.1

        weight_hwc = torch_dwconv_weight_to_hwc(weight_torch).astype(dtype)
        out = dwconv_pallas(x.astype(dtype), weight_hwc, bias.astype(dtype),
                            H=Hs, W=Ws, row_block=row_block)
        out = jax.block_until_ready(out)

        ref = dwconv_reference(x, weight_torch, bias, Hs, Ws)          # f32 reference
        assert out.shape == (B, N, C), (name, out.shape)
        err = float(jnp.max(jnp.abs(out.astype(jnp.float32) - ref)))
        assert jnp.allclose(out.astype(jnp.float32), ref, atol=atol, rtol=rtol), (name, err)

    k0, k1, k2 = jax.random.split(jax.random.PRNGKey(0), 3)
    # 1) whole-map path: C=96 exercises lane padding (96 -> 128), TB=2 batch packing.
    run_case("whole_f32", k0, B=2, C=96, Hs=16, Ws=8)
    # 2) row-tiled path with halo rows: forced 4-row tiles -> grid (1, 4, 1).
    run_case("tiled_f32", k1, B=1, C=64, Hs=16, Ws=8, row_block=4)
    # 3) bf16 compute path (taps/adds in bf16, store bf16).
    run_case("whole_bf16", k2, B=2, C=96, Hs=16, Ws=8, dtype=jnp.bfloat16,
             atol=5e-2, rtol=5e-2)

    print("KERNEL_OK")
</pallas_src>

<mosaic_0001>
module attributes {stable_mosaic.version = 11 : i64} {
  func.func @_dwconv_whole_kernel(%arg0: i32, %arg1: i32, %arg2: memref<2x128x128xf32, #tpu.memory_space<vmem>>, %arg3: memref<3x3x128xf32, #tpu.memory_space<vmem>>, %arg4: memref<1x1x128xf32, #tpu.memory_space<vmem>>, %arg5: memref<2x128x128xf32, #tpu.memory_space<vmem>>) attributes {dimension_semantics = [#tpu.dimension_semantics<parallel>, #tpu.dimension_semantics<parallel>], iteration_bounds = array<i64: 1, 1>, scalar_prefetch = 0 : i64, scratch_operands = 0 : i64, tpu.core_type = #tpu.core_type<tc>, window_params = [{transform_indices = @transform_0, window_bounds = array<i64: 2, 128, 128>}, {transform_indices = @transform_1, window_bounds = array<i64: 3, 3, 128>}, {transform_indices = @transform_2, window_bounds = array<i64: 1, 1, 128>}, {transform_indices = @transform_3, window_bounds = array<i64: 2, 128, 128>}]} {
    %0 = tpu.iota {dimensions = array<i32: 0>} : vector<128x1xi32>
    %c7_i32 = arith.constant 7 : i32
    %1 = vector.broadcast %c7_i32 : i32 to vector<128x1xi32>
    %2 = arith.andi %0, %1 : vector<128x1xi32>
    %c0_i32 = arith.constant 0 : i32
    %3 = vector.broadcast %c0_i32 : i32 to vector<128x1xi32>
    %4 = arith.cmpi ne, %2, %3 : vector<128x1xi32>
    %5 = arith.extui %4 : vector<128x1xi1> to vector<128x1xi32>
    %6 = arith.sitofp %5 : vector<128x1xi32> to vector<128x1xf32>
    %c7_i32_0 = arith.constant 7 : i32
    %7 = vector.broadcast %c7_i32_0 : i32 to vector<128x1xi32>
    %8 = arith.cmpi ne, %2, %7 : vector<128x1xi32>
    %9 = arith.extui %8 : vector<128x1xi1> to vector<128x1xi32>
    %10 = arith.sitofp %9 : vector<128x1xi32> to vector<128x1xf32>
    %c8_i32 = arith.constant 8 : i32
    %11 = vector.broadcast %c8_i32 : i32 to vector<128x1xi32>
    %12 = arith.cmpi sge, %0, %11 : vector<128x1xi32>
    %13 = arith.extui %12 : vector<128x1xi1> to vector<128x1xi32>
    %14 = arith.sitofp %13 : vector<128x1xi32> to vector<128x1xf32>
    %c120_i32 = arith.constant 120 : i32
    %15 = vector.broadcast %c120_i32 : i32 to vector<128x1xi32>
    %16 = arith.cmpi slt, %0, %15 : vector<128x1xi32>
    %17 = arith.extui %16 : vector<128x1xi1> to vector<128x1xi32>
    %18 = arith.sitofp %17 : vector<128x1xi32> to vector<128x1xf32>
    %c0 = arith.constant 0 : index
    %c0_1 = arith.constant 0 : index
    %c0_2 = arith.constant 0 : index
    %19 = vector.load %arg3[%c0, %c0_1, %c0_2] : memref<3x3x128xf32, #tpu.memory_space<vmem>>, vector<1x1x128xf32>
    %20 = vector.shape_cast %19 : vector<1x1x128xf32> to vector<128xf32>
    %c0_3 = arith.constant 0 : index
    %c1 = arith.constant 1 : index
    %c0_4 = arith.constant 0 : index
    %21 = vector.load %arg3[%c0_3, %c1, %c0_4] : memref<3x3x128xf32, #tpu.memory_space<vmem>>, vector<1x1x128xf32>
    %22 = vector.shape_cast %21 : vector<1x1x128xf32> to vector<128xf32>
    %c0_5 = arith.constant 0 : index
    %c2 = arith.constant 2 : index
    %c0_6 = arith.constant 0 : index
    %23 = vector.load %arg3[%c0_5, %c2, %c0_6] : memref<3x3x128xf32, #tpu.memory_space<vmem>>, vector<1x1x128xf32>
    %24 = vector.shape_cast %23 : vector<1x1x128xf32> to vector<128xf32>
    %c1_7 = arith.constant 1 : index
    %c0_8 = arith.constant 0 : index
    %c0_9 = arith.constant 0 : index
    %25 = vector.load %arg3[%c1_7, %c0_8, %c0_9] : memref<3x3x128xf32, #tpu.memory_space<vmem>>, vector<1x1x128xf32>
    %26 = vector.shape_cast %25 : vector<1x1x128xf32> to vector<128xf32>
    %c1_10 = arith.constant 1 : index
    %c1_11 = arith.constant 1 : index
    %c0_12 = arith.constant 0 : index
    %27 = vector.load %arg3[%c1_10, %c1_11, %c0_12] : memref<3x3x128xf32, #tpu.memory_space<vmem>>, vector<1x1x128xf32>
    %28 = vector.shape_cast %27 : vector<1x1x128xf32> to vector<128xf32>
    %c1_13 = arith.constant 1 : index
    %c2_14 = arith.constant 2 : index
    %c0_15 = arith.constant 0 : index
    %29 = vector.load %arg3[%c1_13, %c2_14, %c0_15] : memref<3x3x128xf32, #tpu.memory_space<vmem>>, vector<1x1x128xf32>
    %30 = vector.shape_cast %29 : vector<1x1x128xf32> to vector<128xf32>
    %c2_16 = arith.constant 2 : index
    %c0_17 = arith.constant 0 : index
    %c0_18 = arith.constant 0 : index
    %31 = vector.load %arg3[%c2_16, %c0_17, %c0_18] : memref<3x3x128xf32, #tpu.memory_space<vmem>>, vector<1x1x128xf32>
    %32 = vector.shape_cast %31 : vector<1x1x128xf32> to vector<128xf32>
    %c2_19 = arith.constant 2 : index
    %c1_20 = arith.constant 1 : index
    %c0_21 = arith.constant 0 : index
    %33 = vector.load %arg3[%c2_19, %c1_20, %c0_21] : memref<3x3x128xf32, #tpu.memory_space<vmem>>, vector<1x1x128xf32>
    %34 = vector.shape_cast %33 : vector<1x1x128xf32> to vector<128xf32>
    %c2_22 = arith.constant 2 : index
    %c2_23 = arith.constant 2 : index
    %c0_24 = arith.constant 0 : index
    %35 = vector.load %arg3[%c2_22, %c2_23, %c0_24] : memref<3x3x128xf32, #tpu.memory_space<vmem>>, vector<1x1x128xf32>
    %36 = vector.shape_cast %35 : vector<1x1x128xf32> to vector<128xf32>
    %c0_25 = arith.constant 0 : index
    %c0_26 = arith.constant 0 : index
    %c0_27 = arith.constant 0 : index
    %37 = vector.load %arg4[%c0_25, %c0_26, %c0_27] : memref<1x1x128xf32, #tpu.memory_space<vmem>>, vector<1x1x128xf32>
    %38 = vector.shape_cast %37 : vector<1x1x128xf32> to vector<128xf32>
    %c0_28 = arith.constant 0 : index
    %c0_29 = arith.constant 0 : index
    %c0_30 = arith.constant 0 : index
    %39 = vector.load %arg2[%c0_28, %c0_29, %c0_30] : memref<2x128x128xf32, #tpu.memory_space<vmem>>, vector<1x128x128xf32>
    %40 = vector.shape_cast %39 : vector<1x128x128xf32> to vector<128x128xf32>
    %c1_i32 = arith.constant 1 : i32
    %41 = tpu.dynamic_rotate %40 by %c1_i32 dim 0 : vector<128x128xf32>, i32 -> vector<128x128xf32>
    %42 = vector.broadcast %6 : vector<128x1xf32> to vector<128x128xf32>
    %43 = arith.mulf %41, %42 : vector<128x128xf32>
    %c127_i32 = arith.constant 127 : i32
    %44 = tpu.dynamic_rotate %40 by %c127_i32 dim 0 : vector<128x128xf32>, i32 -> vector<128x128xf32>
    %45 = vector.broadcast %10 : vector<128x1xf32> to vector<128x128xf32>
    %46 = arith.mulf %44, %45 : vector<128x128xf32>
    %47 = vector.shape_cast %20 : vector<128xf32> to vector<1x128xf32>
    %48 = vector.broadcast %47 : vector<1x128xf32> to vector<128x128xf32>
    %49 = arith.mulf %43, %48 : vector<128x128xf32>
    %50 = vector.shape_cast %22 : vector<128xf32> to vector<1x128xf32>
    %51 = vector.broadcast %50 : vector<1x128xf32> to vector<128x128xf32>
    %52 = arith.mulf %40, %51 : vector<128x128xf32>
    %53 = arith.addf %49, %52 : vector<128x128xf32>
    %54 = vector.shape_cast %24 : vector<128xf32> to vector<1x128xf32>
    %55 = vector.broadcast %54 : vector<1x128xf32> to vector<128x128xf32>
    %56 = arith.mulf %46, %55 : vector<128x128xf32>
    %57 = arith.addf %53, %56 : vector<128x128xf32>
    %58 = vector.shape_cast %26 : vector<128xf32> to vector<1x128xf32>
    %59 = vector.broadcast %58 : vector<1x128xf32> to vector<128x128xf32>
    %60 = arith.mulf %43, %59 : vector<128x128xf32>
    %61 = vector.shape_cast %28 : vector<128xf32> to vector<1x128xf32>
    %62 = vector.broadcast %61 : vector<1x128xf32> to vector<128x128xf32>
    %63 = arith.mulf %40, %62 : vector<128x128xf32>
    %64 = arith.addf %60, %63 : vector<128x128xf32>
    %65 = vector.shape_cast %30 : vector<128xf32> to vector<1x128xf32>
    %66 = vector.broadcast %65 : vector<1x128xf32> to vector<128x128xf32>
    %67 = arith.mulf %46, %66 : vector<128x128xf32>
    %68 = arith.addf %64, %67 : vector<128x128xf32>
    %69 = vector.shape_cast %32 : vector<128xf32> to vector<1x128xf32>
    %70 = vector.broadcast %69 : vector<1x128xf32> to vector<128x128xf32>
    %71 = arith.mulf %43, %70 : vector<128x128xf32>
    %72 = vector.shape_cast %34 : vector<128xf32> to vector<1x128xf32>
    %73 = vector.broadcast %72 : vector<1x128xf32> to vector<128x128xf32>
    %74 = arith.mulf %40, %73 : vector<128x128xf32>
    %75 = arith.addf %71, %74 : vector<128x128xf32>
    %76 = vector.shape_cast %36 : vector<128xf32> to vector<1x128xf32>
    %77 = vector.broadcast %76 : vector<1x128xf32> to vector<128x128xf32>
    %78 = arith.mulf %46, %77 : vector<128x128xf32>
    %79 = arith.addf %75, %78 : vector<128x128xf32>
    %80 = vector.shape_cast %38 : vector<128xf32> to vector<1x128xf32>
    %81 = vector.broadcast %80 : vector<1x128xf32> to vector<128x128xf32>
    %82 = arith.addf %68, %81 : vector<128x128xf32>
    %c8_i32_31 = arith.constant 8 : i32
    %83 = tpu.dynamic_rotate %57 by %c8_i32_31 dim 0 : vector<128x128xf32>, i32 -> vector<128x128xf32>
    %84 = vector.broadcast %14 : vector<128x1xf32> to vector<128x128xf32>
    %85 = arith.mulf %83, %84 : vector<128x128xf32>
    %86 = arith.addf %82, %85 : vector<128x128xf32>
    %c120_i32_32 = arith.constant 120 : i32
    %87 = tpu.dynamic_rotate %79 by %c120_i32_32 dim 0 : vector<128x128xf32>, i32 -> vector<128x128xf32>
    %88 = vector.broadcast %18 : vector<128x1xf32> to vector<128x128xf32>
    %89 = arith.mulf %87, %88 : vector<128x128xf32>
    %90 = arith.addf %86, %89 : vector<128x128xf32>
    %c0_33 = arith.constant 0 : index
    %c0_34 = arith.constant 0 : index
    %c0_35 = arith.constant 0 : index
    %91 = vector.load %arg5[%c0_33, %c0_34, %c0_35] : memref<2x128x128xf32, #tpu.memory_space<vmem>>, vector<1x128x128xf32>
    %92 = vector.shape_cast %91 : vector<1x128x128xf32> to vector<128x128xf32>
    %93 = vector.shape_cast %90 : vector<128x128xf32> to vector<1x128x128xf32>
    tpu.vector_store %arg5[%c0_33, %c0_34, %c0_35], %93 {strides = array<i32>} : memref<2x128x128xf32, #tpu.memory_space<vmem>>, vector<1x128x128xf32>,
    %c1_36 = arith.constant 1 : index
    %c0_37 = arith.constant 0 : index
    %c0_38 = arith.constant 0 : index
    %94 = vector.load %arg2[%c1_36, %c0_37, %c0_38] : memref<2x128x128xf32, #tpu.memory_space<vmem>>, vector<1x128x128xf32>
    %95 = vector.shape_cast %94 : vector<1x128x128xf32> to vector<128x128xf32>
    %c1_i32_39 = arith.constant 1 : i32
    %96 = tpu.dynamic_rotate %95 by %c1_i32_39 dim 0 : vector<128x128xf32>, i32 -> vector<128x128xf32>
    %97 = vector.broadcast %6 : vector<128x1xf32> to vector<128x128xf32>
    %98 = arith.mulf %96, %97 : vector<128x128xf32>
    %c127_i32_40 = arith.constant 127 : i32
    %99 = tpu.dynamic_rotate %95 by %c127_i32_40 dim 0 : vector<128x128xf32>, i32 -> vector<128x128xf32>
    %100 = vector.broadcast %10 : vector<128x1xf32> to vector<128x128xf32>
    %101 = arith.mulf %99, %100 : vector<128x128xf32>
    %102 = vector.shape_cast %20 : vector<128xf32> to vector<1x128xf32>
    %103 = vector.broadcast %102 : vector<1x128xf32> to vector<128x128xf32>
    %104 = arith.mulf %98, %103 : vector<128x128xf32>
    %105 = vector.shape_cast %22 : vector<128xf32> to vector<1x128xf32>
    %106 = vector.broadcast %105 : vector<1x128xf32> to vector<128x128xf32>
    %107 = arith.mulf %95, %106 : vector<128x128xf32>
    %108 = arith.addf %104, %107 : vector<128x128xf32>
    %109 = vector.shape_cast %24 : vector<128xf32> to vector<1x128xf32>
    %110 = vector.broadcast %109 : vector<1x128xf32> to vector<128x128xf32>
    %111 = arith.mulf %101, %110 : vector<128x128xf32>
    %112 = arith.addf %108, %111 : vector<128x128xf32>
    %113 = vector.shape_cast %26 : vector<128xf32> to vector<1x128xf32>
    %114 = vector.broadcast %113 : vector<1x128xf32> to vector<128x128xf32>
    %115 = arith.mulf %98, %114 : vector<128x128xf32>
    %116 = vector.shape_cast %28 : vector<128xf32> to vector<1x128xf32>
    %117 = vector.broadcast %116 : vector<1x128xf32> to vector<128x128xf32>
    %118 = arith.mulf %95, %117 : vector<128x128xf32>
    %119 = arith.addf %115, %118 : vector<128x128xf32>
    %120 = vector.shape_cast %30 : vector<128xf32> to vector<1x128xf32>
    %121 = vector.broadcast %120 : vector<1x128xf32> to vector<128x128xf32>
    %122 = arith.mulf %101, %121 : vector<128x128xf32>
    %123 = arith.addf %119, %122 : vector<128x128xf32>
    %124 = vector.shape_cast %32 : vector<128xf32> to vector<1x128xf32>
    %125 = vector.broadcast %124 : vector<1x128xf32> to vector<128x128xf32>
    %126 = arith.mulf %98, %125 : vector<128x128xf32>
    %127 = vector.shape_cast %34 : vector<128xf32> to vector<1x128xf32>
    %128 = vector.broadcast %127 : vector<1x128xf32> to vector<128x128xf32>
    %129 = arith.mulf %95, %128 : vector<128x128xf32>
    %130 = arith.addf %126, %129 : vector<128x128xf32>
    %131 = vector.shape_cast %36 : vector<128xf32> to vector<1x128xf32>
    %132 = vector.broadcast %131 : vector<1x128xf32> to vector<128x128xf32>
    %133 = arith.mulf %101, %132 : vector<128x128xf32>
    %134 = arith.addf %130, %133 : vector<128x128xf32>
    %135 = vector.shape_cast %38 : vector<128xf32> to vector<1x128xf32>
    %136 = vector.broadcast %135 : vector<1x128xf32> to vector<128x128xf32>
    %137 = arith.addf %123, %136 : vector<128x128xf32>
    %c8_i32_41 = arith.constant 8 : i32
    %138 = tpu.dynamic_rotate %112 by %c8_i32_41 dim 0 : vector<128x128xf32>, i32 -> vector<128x128xf32>
    %139 = vector.broadcast %14 : vector<128x1xf32> to vector<128x128xf32>
    %140 = arith.mulf %138, %139 : vector<128x128xf32>
    %141 = arith.addf %137, %140 : vector<128x128xf32>
    %c120_i32_42 = arith.constant 120 : i32
    %142 = tpu.dynamic_rotate %134 by %c120_i32_42 dim 0 : vector<128x128xf32>, i32 -> vector<128x128xf32>
    %143 = vector.broadcast %18 : vector<128x1xf32> to vector<128x128xf32>
    %144 = arith.mulf %142, %143 : vector<128x128xf32>
    %145 = arith.addf %141, %144 : vector<128x128xf32>
    %c1_43 = arith.constant 1 : index
    %c0_44 = arith.constant 0 : index
    %c0_45 = arith.constant 0 : index
    %146 = vector.load %arg5[%c1_43, %c0_44, %c0_45] : memref<2x128x128xf32, #tpu.memory_space<vmem>>, vector<1x128x128xf32>
    %147 = vector.shape_cast %146 : vector<1x128x128xf32> to vector<128x128xf32>
    %148 = vector.shape_cast %145 : vector<128x128xf32> to vector<1x128x128xf32>
    tpu.vector_store %arg5[%c1_43, %c0_44, %c0_45], %148 {strides = array<i32>} : memref<2x128x128xf32, #tpu.memory_space<vmem>>, vector<1x128x128xf32>,
    return
  }
  func.func @transform_0(%arg0: i32, %arg1: i32) -> (i32, i32, i32) {
    %c0_i32 = arith.constant 0 : i32
    %c0_i32_0 = arith.constant 0 : i32
    return %arg0, %c0_i32, %arg1 : i32, i32, i32
  }
  func.func @transform_1(%arg0: i32, %arg1: i32) -> (i32, i32, i32) {
    %c0_i32 = arith.constant 0 : i32
    %c0_i32_0 = arith.constant 0 : i32
    %c0_i32_1 = arith.constant 0 : i32
    return %c0_i32, %c0_i32_0, %arg1 : i32, i32, i32
  }
  func.func @transform_2(%arg0: i32, %arg1: i32) -> (i32, i32, i32) {
    %c0_i32 = arith.constant 0 : i32
    %c0_i32_0 = arith.constant 0 : i32
    %c0_i32_1 = arith.constant 0 : i32
    return %c0_i32, %c0_i32_0, %arg1 : i32, i32, i32
  }
  func.func @transform_3(%arg0: i32, %arg1: i32) -> (i32, i32, i32) {
    %c0_i32 = arith.constant 0 : i32
    %c0_i32_0 = arith.constant 0 : i32
    return %arg0, %c0_i32, %arg1 : i32, i32, i32
  }
}

</mosaic_0001>

<bundles_post_ra>
// kernel: dwconv_pallas.1
= control target key start
LH: loop header
LB: loop body
LE: loop exit
PB: predicated region body
PF: predicated region fallthrough
CT: control target
= control target key end

     0   :  { %8 = vsyncpa [#allocation3], 0  ;;  %s2464_s0 = inlined_call_operand.hbm [shape: f32[2,128,128], index: 0, kind: input, shape index: {}]   ;;  %s2465_s1 = inlined_call_operand.hbm [shape: f32[3,3,128], index: 1, kind: input, shape index: {}]   ;;  %s2466_s2 = inlined_call_operand.hbm [shape: f32[1,1,128], index: 2, kind: input, shape index: {}]   ;;  %s2467_s3 = inlined_call_operand.hbm [shape: f32[2,128,128], index: 3, kind: output, shape index: {}]  }
   0x1   :  { %9 = vsyncpa [#allocation6], 0 }
   0x2   :  { %10 = vsyncpa [#allocation4], 0  ;;  %s1406_s12 = smov [#allocation5]   ;;  %s1312_s16 = scalar_lea.hbm %s2465_s1, 192 }
   0x3   :  { %s28_s13 = sshll.u32 %s1406_s12, 4  ;;  %p1313_p0 = scmp.ne.s32.totalorder %s2465_s1, %s1312_s16  ;;  %s29_s13 = int_to_ptr.vmem [resolvable:$true] %s28_s13 }
   0x4   :  { %p1316_p1 = scmp.lt.u32.totalorder %s1312_s16, %s2465_s1 }
   0x6   :  { %p1318_p2 = pnand %p1316_p1, %p1313_p0 }
   0x8   :  { %1321 = shalt.err (!%p1318_p2)
}
   0x9   :  { %s1322_s21 = scalar_lea.vmem %s29_s13, 192  ;;  %p1327_p4 = scmp.lt.s32.totalorder %s29_s13, %s29_s13 }
   0xa   :  { %p1323_p3 = scmp.ne.s32.totalorder %s29_s13, %s1322_s21  ;;  %p1328_p5 = scmp.lt.s32.totalorder %s1322_s21, %s1322_s21 }
   0xc   :  { %p1329_p6 = por %p1328_p5, %p1327_p4 }
   0xe   :  { %p1330_p7 = pnand %p1329_p6, %p1323_p3 }
  0x10   :  { %1333 = shalt.err (!%p1330_p7)
}
  0x11   :  { %s1407_s22 = smov 64   ;;  %s1408_s23 = smov 4  }
  0x12   :  { %34 = dma.hbm_to_vmem [thread:$0]  %s2465_s1, 192, %s29_s13, [#allocation6], %s1407_s22, %s1407_s22, %s1408_s23  }
  0x13   :  { %s1409_s26 = smov [#allocation2]   ;;  %s1334_s30 = scalar_lea.hbm %s2464_s0, 4096 }
  0x14   :  { %s16_s27 = sshll.u32 %s1409_s26, 4  ;;  %p1335_p8 = scmp.ne.s32.totalorder %s2464_s0, %s1334_s30  ;;  %s17_s27 = int_to_ptr.vmem [resolvable:$true] %s16_s27 }
  0x15   :  { %p1338_p9 = scmp.lt.u32.totalorder %s1334_s30, %s2464_s0 }
  0x17   :  { %p1340_p10 = pnand %p1338_p9, %p1335_p8 }
  0x19   :  { %1343 = shalt.err (!%p1340_p10)
}
  0x1a   :  { %s1344_s8 = scalar_lea.vmem %s17_s27, 4096  ;;  %p1349_p12 = scmp.lt.s32.totalorder %s17_s27, %s17_s27 }
  0x1b   :  { %p1345_p11 = scmp.ne.s32.totalorder %s17_s27, %s1344_s8  ;;  %p1350_p13 = scmp.lt.s32.totalorder %s1344_s8, %s1344_s8 }
  0x1d   :  { %p1351_p0 = por %p1350_p13, %p1349_p12 }
  0x1f   :  { %p1352_p1 = pnand %p1351_p0, %p1345_p11 }
  0x21   :  { %1355 = shalt.err (!%p1352_p1)
}
  0x22   :  { %s1410_s1 = smov 128   ;;  %s1411_s9 = smov 8  }
  0x23   :  { %22 = dma.hbm_to_vmem [thread:$0]  %s2464_s0, 4096, %s17_s27, [#allocation3], %s1410_s1, %s1410_s1, %s1411_s9  }
  0x24   :  { %s1412_s12 = smov [#allocation7]   ;;  %s1356_s16 = scalar_lea.hbm %s2466_s2, 16 }
  0x25   :  { %s41_s13 = sshll.u32 %s1412_s12, 4  ;;  %p1357_p2 = scmp.ne.s32.totalorder %s2466_s2, %s1356_s16  ;;  %s42_s13 = int_to_ptr.vmem [resolvable:$true] %s41_s13 }
  0x26   :  { %p1360_p3 = scmp.lt.u32.totalorder %s1356_s16, %s2466_s2 }
  0x28   :  { %p1362_p4 = pnand %p1360_p3, %p1357_p2 }
  0x2a   :  { %1365 = shalt.err (!%p1362_p4)
}
  0x2b   :  { %s1366_s21 = scalar_lea.vmem %s42_s13, 16  ;;  %s1370_s0 = scalar_lea.vmem %s42_s13, 32 }
  0x2c   :  { %p1367_p5 = scmp.ne.s32.totalorder %s42_s13, %s1366_s21  ;;  %p1371_p6 = scmp.lt.s32.totalorder %s42_s13, %s42_s13 }
  0x2d   :  { %p1372_p7 = scmp.lt.s32.totalorder %s1370_s0, %s1366_s21 }
  0x2f   :  { %p1373_p8 = por %p1372_p7, %p1371_p6 }
  0x31   :  { %p1374_p9 = pnand %p1373_p8, %p1367_p5 }
  0x33   :  { %1377 = shalt.err (!%p1374_p9)
}
  0x34   :  { %44 = dma.hbm_to_vmem [thread:$0]  %s2466_s2, 16, %s42_s13, [#allocation6]  }
  0x35   :  { %1400 = dma.done.wait [#allocation3], 4096  }
  0x36   :  { %1401 = vsyncadd [#allocation3], 4294963200 }
  0x37   :  { %1402 = dma.done.wait [#allocation6], 208  }
  0x38   :  { %1403 = vsyncadd [#allocation6], 4294967088  ;;  %v54_v0 = vlaneseq  ;;  %v2470_v10 = vmov 0.0   ;;  %v1494_v13 = vld [vmem:[#allocation5 + $0x1] ss:$0 sm:$0xff]  ;;  %v1514_v20 = vld [vmem:[#allocation2 + $0x8] sm:$0xff] }
  0x39   :  { %v1510_v18 = vld [vmem:[#allocation5 + $0x5] ss:$0 sm:$0xff]  ;;  %v1516_v21 = vld [vmem:[#allocation2 + $0x10] sm:$0xff]  ;;  %v1523_v26 = vld [vmem:[#allocation2 + $0x78] sm:$0xff]  ;;  %v308_v28 = vrot.slane %v1514_v20, 7  ;;  %v357_v30 = vrot.slane %v1514_v20, 1 }
  0x3a   :  { %v1474_v1 = vshrl.u32 %v54_v0, 7  ;;  %v1512_v19 = vld [vmem:[#allocation2] sm:$0xff]  ;;  %v1521_v25 = vld [vmem:[#allocation2 + $0x70] sm:$0xff]  ;;  %v322_v32 = vrot.slane %v1523_v26, 7  ;;  %v358_v33 = vrot.slane %v1516_v21, 1  ;;  %v2468_v34 = vrot.slane %v1523_v26, 1 }
  0x3b   :  { %v307_v27 = vrot.slane %v1512_v19, 7  ;;  %v356_v29 = vrot.slane %v1512_v19, 1  ;;  %v2469_v31 = vrot.slane %v1521_v25, 7  ;;  %v444_v37 = vmul.f32 %v1494_v13, %v1523_v26  ;;  %v1541_v39 = vld [vmem:[#allocation5] ss:$0 sm:$0xff]  ;;  %s1414_s2 = smov [#allocation8]  }
  0x3c   :  { %v56_v2 = vadd.s32 8, %v1474_v1  ;;  %v70_v3 = vadd.s32 120, %v1474_v1  ;;  %v71_v4 = vand.u32 7, %v1474_v1  ;;  %v1480_v7 = vadd.s32 16, %v1474_v1  ;;  %v1543_v40 = vld [vmem:[#allocation5 + $0x4] ss:$0 sm:$0xff] }
  0x3d   :  { %v1483_v8 = vadd.s32 24, %v1474_v1  ;;  %v1486_v9 = vadd.s32 32, %v1474_v1  ;;  %vm323_vm6 = vcmp.lt.s32.totalorder %v1474_v1, 1  ;;  %vm372_vm7 = vcmp.lt.s32.totalorder %v1474_v1, 7  ;;  %v1545_v41 = vld [vmem:[#allocation5 + $0x6] ss:$0 sm:$0xff] }
  0x3e   :  { %v72_v5 = vand.u32 7, %v56_v2  ;;  %v86_v6 = vand.u32 7, %v70_v3  ;;  %vm87_vm0 = vcmp.ne.s32.totalorder %v71_v4, 0  ;;  %vm135_vm1 = vcmp.ne.s32.totalorder %v71_v4, 7  ;;  %v1558_v46 = vld [vmem:[#allocation5 + $0x2] ss:$0 sm:$0xff] }
  0x3f   :  { %v1489_v11 = vsel %vm87_vm0, 1.0, %v2470_v10  ;;  %v1492_v12 = vsel %vm135_vm1, 1.0, %v2470_v10  ;;  %v73_v22 = vand.u32 7, %v1480_v7  ;;  %v74_v23 = vand.u32 7, %v1483_v8  ;;  %v1560_v47 = vld [vmem:[#allocation5 + $0x8] ss:$0 sm:$0xff] }
  0x40   :  { %vm88_vm2 = vcmp.ne.s32.totalorder %v72_v5, 0  ;;  %vm102_vm3 = vcmp.ne.s32.totalorder %v86_v6, 0  ;;  %vm136_vm4 = vcmp.ne.s32.totalorder %v72_v5, 7  ;;  %vm150_vm5 = vcmp.ne.s32.totalorder %v86_v6, 7  ;;  %v1562_v48 = vld [vmem:[#allocation5 + $0x9] ss:$0 sm:$0xff] }
  0x41   :  { %v1499_v14 = vsel %vm88_vm2, 1.0, %v2470_v10  ;;  %v1502_v15 = vsel %vm102_vm3, 1.0, %v2470_v10  ;;  %v1505_v16 = vsel %vm136_vm4, 1.0, %v2470_v10  ;;  %v1508_v17 = vsel %vm150_vm5, 1.0, %v2470_v10  ;;  %v1585_v57 = vld [vmem:[#allocation5 + $0xa] ss:$0 sm:$0xff] }
  0x42   :  { %v75_v24 = vand.u32 7, %v1486_v9  ;;  %v338_v35 = vsel %vm323_vm6, %v307_v27, %v308_v28  ;;  %v387_v36 = vsel %vm372_vm7, %v356_v29, %v357_v30  ;;  %v521_v38 = vmul.f32 %v1510_v18, %v1512_v19  ;;  %v1599_v4 = vld [vmem:[#allocation2 + $0x18] sm:$0xff]  ;;  %v1602_v6 = vld [vmem:[#allocation7] ss:$0 sm:$0xff]  ;;  %s1238_s24 = sshll.u32 %s1414_s2, 4  ;;  %s1239_s24 = int_to_ptr.vmem [resolvable:$true] %s1238_s24 }
  0x43   :  { %v324_v42 = vsel %vm323_vm6, %v2469_v31, %v322_v32  ;;  %v339_v43 = vsel %vm323_vm6, %v322_v32, %v307_v27  ;;  %v1554_v44 = vmul.f32 %v1499_v14, %v338_v35  ;;  %v386_v45 = vsel %vm372_vm7, %v357_v30, %v358_v33  ;;  %s1378_s25 = scalar_lea.vmem %s1239_s24, 4096  ;;  %p1383_p11 = scmp.lt.s32.totalorder %s1239_s24, %s1239_s24 }
  0x44   :  { %v1565_v49 = vmul.f32 %v1489_v11, %v339_v43  ;;  %v1568_v50 = vmul.f32 %v1502_v15, %v324_v42  ;;  %v388_v51 = vsel %vm372_vm7, %v2468_v34, %v356_v29  ;;  %v1575_v52 = vmul.f32 %v1492_v12, %v387_v36  ;;  %p1379_p10 = scmp.ne.s32.totalorder %s1239_s24, %s1378_s25  ;;  %p1384_p12 = scmp.lt.s32.totalorder %s1378_s25, %s1378_s25 }
  0x45   :  { %v390_v53 = vmul.f32 %v1505_v16, %v386_v45  ;;  %v1579_v54 = vmul.f32 %v1508_v17, %v388_v51  ;;  %v594_v55 = vmul.f32 %v1560_v47, %v1554_v44  ;;  %v614_v56 = vmul.f32 %v1562_v48, %v1514_v20 }
  0x46   :  { %v424_v58 = vmul.f32 %v1541_v39, %v1568_v50  ;;  %v501_v59 = vmul.f32 %v1543_v40, %v1565_v49  ;;  %v557_v60 = vmul.f32 %v1545_v41, %v1575_v52  ;;  %vm89_vm8 = vcmp.ne.s32.totalorder %v73_v22, 0  ;;  %p1385_p13 = por %p1384_p12, %p1383_p11 }
  0x47   :  { %v480_v61 = vmul.f32 %v1558_v46, %v1579_v54  ;;  %v630_v62 = vadd.f32 %v614_v56, %v594_v55  ;;  %v650_v63 = vmul.f32 %v1585_v57, %v390_v53  ;;  %v1597_v0 = vsel %vm89_vm8, 1.0, %v2470_v10 }
  0x48   :  { %v460_v2 = vadd.f32 %v444_v37, %v424_v58  ;;  %v537_v3 = vadd.f32 %v521_v38, %v501_v59  ;;  %vm137_vm9 = vcmp.ne.s32.totalorder %v73_v22, 7  ;;  %v309_v5 = vrot.slane %v1516_v21, 7  ;;  %p1386_p0 = pnand %p1385_p13, %p1379_p10 }
  0x49   :  { %v666_v7 = vadd.f32 %v650_v63, %v630_v62  ;;  %v1605_v27 = vsel %vm137_vm9, 1.0, %v2470_v10  ;;  %v359_v29 = vrot.slane %v1599_v4, 1  ;;  %v409_v30 = vmul.f32 %v1541_v39, %v1565_v49 }
  0x4a   :  { %v496_v32 = vadd.f32 %v480_v61, %v460_v2  ;;  %v573_v35 = vadd.f32 %v557_v60, %v537_v3  ;;  %v337_v22 = vsel %vm323_vm6, %v308_v28, %v309_v5  ;;  %v429_v36 = vmul.f32 %v1494_v13, %v1512_v19 }
  0x4b   :  { %v342_v37 = vmul.f32 %v1597_v0, %v337_v22  ;;  %v385_v38 = vsel %vm372_vm7, %v358_v33, %v359_v29  ;;  %v465_v42 = vmul.f32 %v1558_v46, %v1575_v52  ;;  %v502_v43 = vmul.f32 %v1543_v40, %v1554_v44 }
  0x4c   :  { %v687_v45 = vadd.f32 %v1602_v6, %v573_v35  ;;  %v703_v51 = vmul.f32 0.0, %v496_v32  ;;  %v391_v55 = vmul.f32 %v1605_v27, %v385_v38  ;;  %v445_v28 = vadd.f32 %v429_v36, %v409_v30  ;;  %v1637_v30 = vld [vmem:[#allocation2 + $0x20] sm:$0xff] }
  0x4d   :  { %v522_v56 = vmul.f32 %v1510_v18, %v1514_v20  ;;  %v558_v58 = vmul.f32 %v1545_v41, %v390_v53  ;;  %v595_v59 = vmul.f32 %v1560_v47, %v342_v37  ;;  %v615_v33 = vmul.f32 %v1562_v48, %v1516_v21 }
  0x4e   :  { %v719_v60 = vadd.f32 %v703_v51, %v687_v45  ;;  %v481_v61 = vadd.f32 %v465_v42, %v445_v28  ;;  %v651_v62 = vmul.f32 %v1585_v57, %v391_v55  ;;  %vm90_vm10 = vcmp.ne.s32.totalorder %v74_v23, 0 }
  0x4f   :  { %v538_v63 = vadd.f32 %v522_v56, %v502_v43  ;;  %v631_v2 = vadd.f32 %v615_v33, %v595_v59  ;;  %v1633_v3 = vsel %vm90_vm10, 1.0, %v2470_v10  ;;  %vm138_vm11 = vcmp.ne.s32.totalorder %v74_v23, 7 }
  0x50   :  { %v751_v32 = vadd.f32 %v719_v60, %v666_v7  ;;  %v1640_v35 = vsel %vm138_vm11, 1.0, %v2470_v10  ;;  %v310_v22 = vrot.slane %v1599_v4, 7  ;;  %v360_v36 = vrot.slane %v1637_v30, 1 }
  0x51   :  { %v574_v38 = vadd.f32 %v558_v58, %v538_v63  ;;  %v667_v42 = vadd.f32 %v651_v62, %v631_v2  ;;  %v410_v43 = vmul.f32 %v1541_v39, %v1554_v44  ;;  %v430_v45 = vmul.f32 %v1494_v13, %v1514_v20  ;;  %v1671_v2 = vld [vmem:[#allocation2 + $0x28] sm:$0xff] }
  0x52   :  { %767 = vst [vmem:[#allocation8] sm:$0xff] %v751_v32  ;;  %v336_v8 = vsel %vm323_vm6, %v309_v5, %v310_v22  ;;  %v384_v23 = vsel %vm372_vm7, %v359_v29, %v360_v36  ;;  %v466_v7 = vmul.f32 %v1558_v46, %v390_v53  ;;  %v503_v51 = vmul.f32 %v1543_v40, %v342_v37 }
  0x53   :  { %v688_v28 = vadd.f32 %v1602_v6, %v574_v38  ;;  %v343_v56 = vmul.f32 %v1633_v3, %v336_v8  ;;  %v392_v44 = vmul.f32 %v1640_v35, %v384_v23  ;;  %v446_v58 = vadd.f32 %v430_v45, %v410_v43 }
  0x54   :  { %v523_v20 = vmul.f32 %v1510_v18, %v1516_v21  ;;  %v559_v59 = vmul.f32 %v1545_v41, %v391_v55  ;;  %v616_v5 = vmul.f32 %v1562_v48, %v1599_v4  ;;  %vm91_vm12 = vcmp.ne.s32.totalorder %v75_v24, 0 }
  0x55   :  { %v720_v53 = vadd.f32 %v688_v28, %v481_v61  ;;  %v482_v29 = vadd.f32 %v466_v7, %v446_v58  ;;  %v596_v33 = vmul.f32 %v1560_v47, %v343_v56  ;;  %v652_v60 = vmul.f32 %v1585_v57, %v392_v44 }
  0x56   :  { %v539_v62 = vadd.f32 %v523_v20, %v503_v51  ;;  %v1667_v63 = vsel %vm91_vm12, 1.0, %v2470_v10  ;;  %vm139_vm13 = vcmp.ne.s32.totalorder %v75_v24, 7  ;;  %v311_v32 = vrot.slane %v1637_v30, 7 }
  0x57   :  { %v752_v38 = vadd.f32 %v720_v53, %v667_v42  ;;  %v632_v43 = vadd.f32 %v616_v5, %v596_v33  ;;  %v1675_v61 = vsel %vm139_vm13, 1.0, %v2470_v10  ;;  %v361_v45 = vrot.slane %v1671_v2, 1 }
  0x58   :  { %v575_v8 = vadd.f32 %v559_v59, %v539_v62  ;;  %v335_v23 = vsel %vm323_vm6, %v310_v22, %v311_v32  ;;  %v411_v7 = vmul.f32 %v1541_v39, %v342_v37  ;;  %v431_v9 = vmul.f32 %v1494_v13, %v1516_v21  ;;  %v1698_v62 = vld [vmem:[#allocation2 + $0x30] sm:$0xff] }
  0x59   :  { %768 = vst [vmem:[#allocation8 + $0x8] sm:$0xff] %v752_v38  ;;  %v668_v24 = vadd.f32 %v652_v60, %v632_v43  ;;  %v344_v51 = vmul.f32 %v1667_v63, %v335_v23  ;;  %v383_v42 = vsel %vm372_vm7, %v360_v36, %v361_v45  ;;  %v467_v28 = vmul.f32 %v1558_v46, %v391_v55 }
  0x5a   :  { %v689_v58 = vadd.f32 %v1602_v6, %v575_v8  ;;  %v393_v20 = vmul.f32 %v1675_v61, %v383_v42  ;;  %v447_v59 = vadd.f32 %v431_v9, %v411_v7  ;;  %v504_v22 = vmul.f32 %v1543_v40, %v343_v56 }
  0x5b   :  { %v524_v37 = vmul.f32 %v1510_v18, %v1599_v4  ;;  %v560_v21 = vmul.f32 %v1545_v41, %v392_v44  ;;  %v597_v5 = vmul.f32 %v1560_v47, %v344_v51  ;;  %v617_v53 = vmul.f32 %v1562_v48, %v1637_v30 }
  0x5c   :  { %v721_v36 = vadd.f32 %v689_v58, %v482_v29  ;;  %v483_v33 = vadd.f32 %v467_v28, %v447_v59  ;;  %v653_v55 = vmul.f32 %v1585_v57, %v393_v20  ;;  %v60_v60 = vadd.s32 40, %v1474_v1 }
  0x5d   :  { %v540_v38 = vadd.f32 %v524_v37, %v504_v22  ;;  %v633_v43 = vadd.f32 %v617_v53, %v597_v5  ;;  %v312_v8 = vrot.slane %v1671_v2, 7  ;;  %v362_v23 = vrot.slane %v1698_v62, 1 }
  0x5e   :  { %v753_v7 = vadd.f32 %v721_v36, %v668_v24  ;;  %v76_v9 = vand.u32 7, %v60_v60  ;;  %v412_v42 = vmul.f32 %v1541_v39, %v343_v56  ;;  %v432_v29 = vmul.f32 %v1494_v13, %v1599_v4 }
  0x5f   :  { %v576_v28 = vadd.f32 %v560_v21, %v540_v38  ;;  %v669_v58 = vadd.f32 %v653_v55, %v633_v43  ;;  %v334_v59 = vsel %vm323_vm6, %v311_v32, %v312_v8  ;;  %v382_v22 = vsel %vm372_vm7, %v361_v45, %v362_v23 }
  0x60   :  { %769 = vst [vmem:[#allocation8 + $0x10] sm:$0xff] %v753_v7  ;;  %vm92_vm14 = vcmp.ne.s32.totalorder %v76_v9, 0  ;;  %vm140_vm15 = vcmp.ne.s32.totalorder %v76_v9, 7  ;;  %v448_v37 = vadd.f32 %v432_v29, %v412_v42  ;;  %v468_v24 = vmul.f32 %v1558_v46, %v392_v44  ;;  %v1728_v42 = vld [vmem:[#allocation2 + $0x38] sm:$0xff] }
  0x61   :  { %v690_v5 = vadd.f32 %v1602_v6, %v576_v28  ;;  %v1712_v56 = vsel %vm92_vm14, 1.0, %v2470_v10  ;;  %v1715_v4 = vsel %vm140_vm15, 1.0, %v2470_v10  ;;  %v505_v21 = vmul.f32 %v1543_v40, %v344_v51 }
  0x62   :  { %v345_v32 = vmul.f32 %v1712_v56, %v334_v59  ;;  %v394_v45 = vmul.f32 %v1715_v4, %v382_v22  ;;  %v484_v53 = vadd.f32 %v468_v24, %v448_v37  ;;  %v525_v36 = vmul.f32 %v1510_v18, %v1637_v30 }
  0x63   :  { %v722_v55 = vadd.f32 %v690_v5, %v483_v33  ;;  %v561_v44 = vmul.f32 %v1545_v41, %v393_v20  ;;  %v618_v60 = vmul.f32 %v1562_v48, %v1671_v2  ;;  %v61_v38 = vadd.s32 48, %v1474_v1 }
  0x64   :  { %v541_v43 = vadd.f32 %v525_v36, %v505_v21  ;;  %v598_v7 = vmul.f32 %v1560_v47, %v345_v32  ;;  %v654_v9 = vmul.f32 %v1585_v57, %v394_v45  ;;  %v313_v29 = vrot.slane %v1698_v62, 7 }
  0x65   :  { %v754_v28 = vadd.f32 %v722_v55, %v669_v58  ;;  %v77_v59 = vand.u32 7, %v61_v38  ;;  %v363_v33 = vrot.slane %v1728_v42, 1  ;;  %v413_v22 = vmul.f32 %v1541_v39, %v344_v51 }
  0x66   :  { %v577_v37 = vadd.f32 %v561_v44, %v541_v43  ;;  %v634_v24 = vadd.f32 %v618_v60, %v598_v7  ;;  %v333_v5 = vsel %vm323_vm6, %v312_v8, %v313_v29  ;;  %v433_v21 = vmul.f32 %v1494_v13, %v1637_v30 }
  0x67   :  { %770 = vst [vmem:[#allocation8 + $0x18] sm:$0xff] %v754_v28  ;;  %vm93_vm0 = vcmp.ne.s32.totalorder %v77_v59, 0  ;;  %vm141_vm1 = vcmp.ne.s32.totalorder %v77_v59, 7  ;;  %v381_v36 = vsel %vm372_vm7, %v362_v23, %v363_v33  ;;  %v469_v58 = vmul.f32 %v1558_v46, %v393_v20 }
  0x68   :  { %v670_v55 = vadd.f32 %v654_v9, %v634_v24  ;;  %v691_v38 = vadd.f32 %v1602_v6, %v577_v37  ;;  %v1742_v51 = vsel %vm93_vm0, 1.0, %v2470_v10  ;;  %v1745_v44 = vsel %vm141_vm1, 1.0, %v2470_v10 }
  0x69   :  { %2485 = vst [vmem:[#allocation12_spill] sm:$0xff] %v1745_v44  ;;  %v346_v8 = vmul.f32 %v1742_v51, %v333_v5  ;;  %v395_v30 = vmul.f32 %v1745_v44, %v381_v36  ;;  %v449_v60 = vadd.f32 %v433_v21, %v413_v22  ;;  %v506_v43 = vmul.f32 %v1543_v40, %v345_v32  ;;  %v1758_v5 = vld [vmem:[#allocation2 + $0x40] sm:$0xff] }
  0x6a   :  { %v723_v7 = vadd.f32 %v691_v38, %v484_v53  ;;  %v526_v20 = vmul.f32 %v1510_v18, %v1671_v2  ;;  %v562_v23 = vmul.f32 %v1545_v41, %v394_v45  ;;  %v619_v9 = vmul.f32 %v1562_v48, %v1698_v62 }
  0x6b   :  { %v485_v28 = vadd.f32 %v469_v58, %v449_v60  ;;  %v599_v59 = vmul.f32 %v1560_v47, %v346_v8  ;;  %v655_v37 = vmul.f32 %v1585_v57, %v395_v30  ;;  %v62_v24 = vadd.s32 56, %v1474_v1 }
  0x6c   :  { %v755_v22 = vadd.f32 %v723_v7, %v670_v55  ;;  %v542_v21 = vadd.f32 %v526_v20, %v506_v43  ;;  %v314_v53 = vrot.slane %v1728_v42, 7  ;;  %v364_v36 = vrot.slane %v1758_v5, 1 }
  0x6d   :  { %v635_v38 = vadd.f32 %v619_v9, %v599_v59  ;;  %v78_v34 = vand.u32 7, %v62_v24  ;;  %v414_v31 = vmul.f32 %v1541_v39, %v345_v32  ;;  %v434_v58 = vmul.f32 %v1494_v13, %v1671_v2 }
  0x6e   :  { %771 = vst [vmem:[#allocation8 + $0x20] sm:$0xff] %v755_v22  ;;  %v578_v60 = vadd.f32 %v562_v23, %v542_v21  ;;  %v332_v10 = vsel %vm323_vm6, %v313_v29, %v314_v53  ;;  %v380_v55 = vsel %vm372_vm7, %v363_v33, %v364_v36  ;;  %v470_v43 = vmul.f32 %v1558_v46, %v394_v45 }
  0x6f   :  { %v671_v7 = vadd.f32 %v655_v37, %v635_v38  ;;  %vm94_vm2 = vcmp.ne.s32.totalorder %v78_v34, 0  ;;  %vm142_vm3 = vcmp.ne.s32.totalorder %v78_v34, 7  ;;  %v450_v20 = vadd.f32 %v434_v58, %v414_v31 }
  0x70   :  { %v692_v9 = vadd.f32 %v1602_v6, %v578_v60  ;;  %v2486_v32 = vmov 0.0   ;;  %v507_v23 = vmul.f32 %v1543_v40, %v346_v8  ;;  %v527_v45 = vmul.f32 %v1510_v18, %v1698_v62 }
  0x71   :  { %v1772_v59 = vsel %vm94_vm2, 1.0, %v2486_v32  ;;  %v1775_v2 = vsel %vm142_vm3, 1.0, %v2486_v32  ;;  %v486_v24 = vadd.f32 %v470_v43, %v450_v20  ;;  %v563_v31 = vmul.f32 %v1545_v41, %v395_v30 }
  0x72   :  { %2487 = vst [vmem:[#allocation13_spill] sm:$0xff] %v1772_v59  ;;  %2488 = vst [vmem:[#allocation14_spill] sm:$0xff] %v1775_v2  ;;  %v347_v29 = vmul.f32 %v1772_v59, %v332_v10  ;;  %v396_v33 = vmul.f32 %v1775_v2, %v380_v55  ;;  %v724_v34 = vadd.f32 %v692_v9, %v485_v28  ;;  %v63_v22 = vadd.s32 64, %v1474_v1  ;;  %v1788_v10 = vld [vmem:[#allocation2 + $0x48] sm:$0xff] }
  0x73   :  { %v620_v37 = vmul.f32 %v1562_v48, %v1728_v42  ;;  %v543_v21 = vadd.f32 %v527_v45, %v507_v23  ;;  %v315_v60 = vrot.slane %v1758_v5, 7  ;;  %v365_v28 = vrot.slane %v1788_v10, 1 }
  0x74   :  { %v600_v38 = vmul.f32 %v1560_v47, %v347_v29  ;;  %v656_v58 = vmul.f32 %v1585_v57, %v396_v33  ;;  %v756_v55 = vadd.f32 %v724_v34, %v671_v7  ;;  %v79_v43 = vand.u32 7, %v63_v22 }
  0x75   :  { %v415_v20 = vmul.f32 %v1541_v39, %v346_v8  ;;  %v579_v9 = vadd.f32 %v563_v31, %v543_v21  ;;  %v331_v59 = vsel %vm323_vm6, %v314_v53, %v315_v60  ;;  %v435_v23 = vmul.f32 %v1494_v13, %v1698_v62 }
  0x76   :  { %v636_v2 = vadd.f32 %v620_v37, %v600_v38  ;;  %772 = vst [vmem:[#allocation8 + $0x28] sm:$0xff] %v756_v55  ;;  %vm95_vm4 = vcmp.ne.s32.totalorder %v79_v43, 0  ;;  %vm143_vm5 = vcmp.ne.s32.totalorder %v79_v43, 7  ;;  %v379_v45 = vsel %vm372_vm7, %v364_v36, %v365_v28 }
  0x77   :  { %v471_v7 = vmul.f32 %v1558_v46, %v395_v30  ;;  %v693_v22 = vadd.f32 %v1602_v6, %v579_v9  ;;  %v1802_v8 = vsel %vm95_vm4, 1.0, %v2486_v32  ;;  %v1805_v31 = vsel %vm143_vm5, 1.0, %v2486_v32  ;;  %v1818_v9 = vld [vmem:[#allocation2 + $0x50] sm:$0xff] }
  0x78   :  { %v672_v34 = vadd.f32 %v656_v58, %v636_v2  ;;  %2489 = vst [vmem:[#allocation15_spill] sm:$0xff] %v1802_v8  ;;  %2490 = vst [vmem:[#allocation16_spill] sm:$0xff] %v1805_v31  ;;  %v348_v53 = vmul.f32 %v1802_v8, %v331_v59  ;;  %v397_v62 = vmul.f32 %v1805_v31, %v379_v45  ;;  %v64_v59 = vadd.s32 72, %v1474_v1 }
  0x79   :  { %v451_v37 = vadd.f32 %v435_v23, %v415_v20  ;;  %v508_v21 = vmul.f32 %v1543_v40, %v347_v29  ;;  %v725_v38 = vadd.f32 %v693_v22, %v486_v24  ;;  %v528_v30 = vmul.f32 %v1510_v18, %v1728_v42 }
  0x7a   :  { %v564_v36 = vmul.f32 %v1545_v41, %v396_v33  ;;  %v621_v2 = vmul.f32 %v1562_v48, %v1758_v5  ;;  %v601_v55 = vmul.f32 %v1560_v47, %v348_v53  ;;  %v657_v43 = vmul.f32 %v1585_v57, %v397_v62 }
  0x7b   :  { %v487_v58 = vadd.f32 %v471_v7, %v451_v37  ;;  %v757_v20 = vadd.f32 %v725_v38, %v672_v34  ;;  %v544_v23 = vadd.f32 %v528_v30, %v508_v21  ;;  %v316_v24 = vrot.slane %v1788_v10, 7 }
  0x7c   :  { %v366_v45 = vrot.slane %v1818_v9, 1  ;;  %v637_v22 = vadd.f32 %v621_v2, %v601_v55  ;;  %v80_v31 = vand.u32 7, %v64_v59  ;;  %v416_v8 = vmul.f32 %v1541_v39, %v347_v29 }
  0x7d   :  { %v436_v7 = vmul.f32 %v1494_v13, %v1728_v42  ;;  %773 = vst [vmem:[#allocation8 + $0x30] sm:$0xff] %v757_v20  ;;  %v580_v37 = vadd.f32 %v564_v36, %v544_v23  ;;  %v330_v44 = vsel %vm323_vm6, %v315_v60, %v316_v24  ;;  %v472_v21 = vmul.f32 %v1558_v46, %v396_v33 }
  0x7e   :  { %v378_v34 = vsel %vm372_vm7, %v365_v28, %v366_v45  ;;  %v673_v38 = vadd.f32 %v657_v43, %v637_v22  ;;  %vm96_vm8 = vcmp.ne.s32.totalorder %v80_v31, 0  ;;  %vm144_vm9 = vcmp.ne.s32.totalorder %v80_v31, 7 }
  0x7f   :  { %v452_v30 = vadd.f32 %v436_v7, %v416_v8  ;;  %v694_v2 = vadd.f32 %v1602_v6, %v580_v37  ;;  %v1832_v29 = vsel %vm96_vm8, 1.0, %v2486_v32  ;;  %v1835_v42 = vsel %vm144_vm9, 1.0, %v2486_v32 }
  0x80   :  { %2491 = vst [vmem:[#allocation17_spill] sm:$0xff] %v1832_v29  ;;  %2492 = vst [vmem:[#allocation18_spill] sm:$0xff] %v1835_v42  ;;  %v509_v36 = vmul.f32 %v1543_v40, %v348_v53  ;;  %v349_v60 = vmul.f32 %v1832_v29, %v330_v44  ;;  %v398_v28 = vmul.f32 %v1835_v42, %v378_v34  ;;  %v65_v59 = vadd.s32 80, %v1474_v1  ;;  %v1848_v44 = vld [vmem:[#allocation2 + $0x58] sm:$0xff] }
  0x81   :  { %v488_v55 = vadd.f32 %v472_v21, %v452_v30  ;;  %v529_v33 = vmul.f32 %v1510_v18, %v1758_v5  ;;  %v726_v31 = vadd.f32 %v694_v2, %v487_v58  ;;  %v565_v8 = vmul.f32 %v1545_v41, %v397_v62 }
  0x82   :  { %v622_v43 = vmul.f32 %v1562_v48, %v1788_v10  ;;  %v602_v23 = vmul.f32 %v1560_v47, %v349_v60  ;;  %v658_v22 = vmul.f32 %v1585_v57, %v398_v28  ;;  %v317_v7 = vrot.slane %v1818_v9, 7 }
  0x83   :  { %v545_v20 = vadd.f32 %v529_v33, %v509_v36  ;;  %v758_v37 = vadd.f32 %v726_v31, %v673_v38  ;;  %v81_v34 = vand.u32 7, %v65_v59  ;;  %v367_v58 = vrot.slane %v1848_v44, 1 }
  0x84   :  { %v417_v21 = vmul.f32 %v1541_v39, %v348_v53  ;;  %v638_v2 = vadd.f32 %v622_v43, %v602_v23  ;;  %v329_v42 = vsel %vm323_vm6, %v316_v24, %v317_v7  ;;  %v437_v36 = vmul.f32 %v1494_v13, %v1758_v5 }
  0x85   :  { %v581_v30 = vadd.f32 %v565_v8, %v545_v20  ;;  %774 = vst [vmem:[#allocation8 + $0x38] sm:$0xff] %v758_v37  ;;  %vm97_vm10 = vcmp.ne.s32.totalorder %v81_v34, 0  ;;  %vm145_vm11 = vcmp.ne.s32.totalorder %v81_v34, 7  ;;  %v377_v33 = vsel %vm372_vm7, %v366_v45, %v367_v58 }
  0x86   :  { %v473_v38 = vmul.f32 %v1558_v46, %v397_v62  ;;  %v674_v31 = vadd.f32 %v658_v22, %v638_v2  ;;  %v1862_v53 = vsel %vm97_vm10, 1.0, %v2486_v32  ;;  %v1865_v8 = vsel %vm145_vm11, 1.0, %v2486_v32  ;;  %v1878_v2 = vld [vmem:[#allocation2 + $0x60] sm:$0xff] }
  0x87   :  { %v695_v59 = vadd.f32 %v1602_v6, %v581_v30  ;;  %2493 = vst [vmem:[#allocation19_spill] sm:$0xff] %v1862_v53  ;;  %2494 = vst [vmem:[#allocation20_spill] sm:$0xff] %v1865_v8  ;;  %v350_v24 = vmul.f32 %v1862_v53, %v329_v42  ;;  %v399_v5 = vmul.f32 %v1865_v8, %v377_v33  ;;  %v66_v42 = vadd.s32 88, %v1474_v1 }
  0x88   :  { %v453_v43 = vadd.f32 %v437_v36, %v417_v21  ;;  %v510_v20 = vmul.f32 %v1543_v40, %v349_v60  ;;  %v530_v62 = vmul.f32 %v1510_v18, %v1788_v10  ;;  %v566_v45 = vmul.f32 %v1545_v41, %v398_v28 }
  0x89   :  { %v727_v23 = vadd.f32 %v695_v59, %v488_v55  ;;  %v623_v22 = vmul.f32 %v1562_v48, %v1818_v9  ;;  %v603_v34 = vmul.f32 %v1560_v47, %v350_v24  ;;  %v659_v30 = vmul.f32 %v1585_v57, %v399_v5 }
  0x8a   :  { %v489_v37 = vadd.f32 %v473_v38, %v453_v43  ;;  %v546_v36 = vadd.f32 %v530_v62, %v510_v20  ;;  %v318_v55 = vrot.slane %v1848_v44, 7  ;;  %v368_v33 = vrot.slane %v1878_v2, 1 }
  0x8b   :  { %v759_v21 = vadd.f32 %v727_v23, %v674_v31  ;;  %v639_v59 = vadd.f32 %v623_v22, %v603_v34  ;;  %v82_v8 = vand.u32 7, %v66_v42  ;;  %v418_v53 = vmul.f32 %v1541_v39, %v349_v60 }
  0x8c   :  { %v438_v38 = vmul.f32 %v1494_v13, %v1788_v10  ;;  %v582_v43 = vadd.f32 %v566_v45, %v546_v36  ;;  %v328_v29 = vsel %vm323_vm6, %v317_v7, %v318_v55  ;;  %v376_v31 = vsel %vm372_vm7, %v367_v58, %v368_v33 }
  0x8d   :  { %775 = vst [vmem:[#allocation8 + $0x40] sm:$0xff] %v759_v21  ;;  %v474_v20 = vmul.f32 %v1558_v46, %v398_v28  ;;  %v675_v23 = vadd.f32 %v659_v30, %v639_v59  ;;  %vm98_vm12 = vcmp.ne.s32.totalorder %v82_v8, 0  ;;  %vm146_vm13 = vcmp.ne.s32.totalorder %v82_v8, 7 }
  0x8e   :  { %v454_v62 = vadd.f32 %v438_v38, %v418_v53  ;;  %v696_v22 = vadd.f32 %v1602_v6, %v582_v43  ;;  %v1892_v60 = vsel %vm98_vm12, 1.0, %v2486_v32  ;;  %v1895_v10 = vsel %vm146_vm13, 1.0, %v2486_v32 }
  0x8f   :  { %2495 = vst [vmem:[#allocation21_spill] sm:$0xff] %v1895_v10  ;;  %v511_v45 = vmul.f32 %v1543_v40, %v350_v24  ;;  %v351_v7 = vmul.f32 %v1892_v60, %v328_v29  ;;  %v400_v58 = vmul.f32 %v1895_v10, %v376_v31  ;;  %v531_v28 = vmul.f32 %v1510_v18, %v1818_v9  ;;  %v1908_v29 = vld [vmem:[#allocation2 + $0x68] sm:$0xff] }
  0x90   :  { %v490_v34 = vadd.f32 %v474_v20, %v454_v62  ;;  %v728_v8 = vadd.f32 %v696_v22, %v489_v37  ;;  %v567_v53 = vmul.f32 %v1545_v41, %v399_v5  ;;  %v624_v30 = vmul.f32 %v1562_v48, %v1848_v44 }
  0x91   :  { %v67_v42 = vadd.s32 96, %v1474_v1  ;;  %v547_v21 = vadd.f32 %v531_v28, %v511_v45  ;;  %v604_v36 = vmul.f32 %v1560_v47, %v351_v7  ;;  %v660_v59 = vmul.f32 %v1585_v57, %v400_v58 }
  0x92   :  { %v319_v38 = vrot.slane %v1878_v2, 7  ;;  %v760_v43 = vadd.f32 %v728_v8, %v675_v23  ;;  %v369_v37 = vrot.slane %v1908_v29, 1  ;;  %v419_v20 = vmul.f32 %v1541_v39, %v350_v24 }
  0x93   :  { %v83_v31 = vand.u32 7, %v67_v42  ;;  %v583_v62 = vadd.f32 %v567_v53, %v547_v21  ;;  %v640_v22 = vadd.f32 %v624_v30, %v604_v36  ;;  %v439_v45 = vmul.f32 %v1494_v13, %v1818_v9 }
  0x94   :  { %v327_v10 = vsel %vm323_vm6, %v318_v55, %v319_v38  ;;  %776 = vst [vmem:[#allocation8 + $0x48] sm:$0xff] %v760_v43  ;;  %v375_v28 = vsel %vm372_vm7, %v368_v33, %v369_v37  ;;  %v475_v23 = vmul.f32 %v1558_v46, %v399_v5  ;;  %v512_v21 = vmul.f32 %v1543_v40, %v351_v7 }
  0x95   :  { %vm99_vm14 = vcmp.ne.s32.totalorder %v83_v31, 0  ;;  %vm147_vm15 = vcmp.ne.s32.totalorder %v83_v31, 7  ;;  %v676_v8 = vadd.f32 %v660_v59, %v640_v22  ;;  %v697_v42 = vadd.f32 %v1602_v6, %v583_v62 }
  0x96   :  { %v1922_v24 = vsel %vm99_vm14, 1.0, %v2486_v32  ;;  %v1925_v53 = vsel %vm147_vm15, 1.0, %v2486_v32  ;;  %v455_v30 = vadd.f32 %v439_v45, %v419_v20  ;;  %v532_v5 = vmul.f32 %v1510_v18, %v1848_v44 }
  0x97   :  { %2496 = vst [vmem:[#allocation22_spill] sm:$0xff] %v1922_v24  ;;  %2497 = vst [vmem:[#allocation23_spill] sm:$0xff] %v1925_v53  ;;  %v352_v55 = vmul.f32 %v1922_v24, %v327_v10  ;;  %v401_v9 = vmul.f32 %v1925_v53, %v375_v28  ;;  %v729_v36 = vadd.f32 %v697_v42, %v490_v34  ;;  %v68_v10 = vadd.s32 104, %v1474_v1 }
  0x98   :  { %v568_v33 = vmul.f32 %v1545_v41, %v400_v58  ;;  %v625_v59 = vmul.f32 %v1562_v48, %v1878_v2  ;;  %v491_v43 = vadd.f32 %v475_v23, %v455_v30  ;;  %v548_v20 = vadd.f32 %v532_v5, %v512_v21 }
  0x99   :  { %v605_v31 = vmul.f32 %v1560_v47, %v352_v55  ;;  %v661_v62 = vmul.f32 %v1585_v57, %v401_v9  ;;  %v761_v22 = vadd.f32 %v729_v36, %v676_v8  ;;  %v320_v45 = vrot.slane %v1908_v29, 7 }
  0x9a   :  { %v370_v34 = vrot.slane %v1521_v25, 1  ;;  %v84_v42 = vand.u32 7, %v68_v10  ;;  %v420_v53 = vmul.f32 %v1541_v39, %v351_v7  ;;  %v440_v24 = vmul.f32 %v1494_v13, %v1848_v44 }
  0x9b   :  { %v641_v28 = vadd.f32 %v625_v59, %v605_v31  ;;  %777 = vst [vmem:[#allocation8 + $0x50] sm:$0xff] %v761_v22  ;;  %v584_v23 = vadd.f32 %v568_v33, %v548_v20  ;;  %v326_v30 = vsel %vm323_vm6, %v319_v38, %v320_v45  ;;  %v476_v21 = vmul.f32 %v1558_v46, %v400_v58 }
  0x9c   :  { %v374_v8 = vsel %vm372_vm7, %v369_v37, %v370_v34  ;;  %vm100_vm0 = vcmp.ne.s32.totalorder %v84_v42, 0  ;;  %vm148_vm1 = vcmp.ne.s32.totalorder %v84_v42, 7  ;;  %v456_v5 = vadd.f32 %v440_v24, %v420_v53 }
  0x9d   :  { %v677_v36 = vadd.f32 %v661_v62, %v641_v28  ;;  %v698_v59 = vadd.f32 %v1602_v6, %v584_v23  ;;  %v1950_v7 = vsel %vm100_vm0, 1.0, %v2486_v32  ;;  %v1953_v44 = vsel %vm148_vm1, 1.0, %v2486_v32 }
  0x9e   :  { %2498 = vst [vmem:[#allocation24_spill] sm:$0xff] %v1953_v44  ;;  %v513_v33 = vmul.f32 %v1543_v40, %v352_v55  ;;  %v353_v38 = vmul.f32 %v1950_v7, %v326_v30  ;;  %v402_v37 = vmul.f32 %v1953_v44, %v374_v8  ;;  %v492_v31 = vadd.f32 %v476_v21, %v456_v5 }
  0x9f   :  { %v533_v58 = vmul.f32 %v1510_v18, %v1878_v2  ;;  %v730_v62 = vadd.f32 %v698_v59, %v491_v43  ;;  %v569_v24 = vmul.f32 %v1545_v41, %v401_v9  ;;  %v626_v53 = vmul.f32 %v1562_v48, %v1908_v29 }
  0xa0   :  { %v69_v10 = vadd.s32 112, %v1474_v1  ;;  %v606_v20 = vmul.f32 %v1560_v47, %v353_v38  ;;  %v662_v28 = vmul.f32 %v1585_v57, %v402_v37  ;;  %v2499_v42 = vrot.slane %v1521_v25, 7 }
  0xa1   :  { %v549_v22 = vadd.f32 %v533_v58, %v513_v33  ;;  %v762_v30 = vadd.f32 %v730_v62, %v677_v36  ;;  %v2500_v43 = vrot.slane %v1523_v26, 1  ;;  %v421_v5 = vmul.f32 %v1541_v39, %v352_v55 }
  0xa2   :  { %v325_v23 = vsel %vm323_vm6, %v320_v45, %v2499_v42  ;;  %v85_v8 = vand.u32 7, %v69_v10  ;;  %v642_v33 = vadd.f32 %v626_v53, %v606_v20  ;;  %v441_v58 = vmul.f32 %v1494_v13, %v1878_v2 }
  0xa3   :  { %v373_v21 = vsel %vm372_vm7, %v370_v34, %v2500_v43  ;;  %v585_v59 = vadd.f32 %v569_v24, %v549_v22  ;;  %v477_v44 = vmul.f32 %v1558_v46, %v401_v9  ;;  %778 = vst [vmem:[#allocation8 + $0x58] sm:$0xff] %v762_v30  ;;  %v514_v45 = vmul.f32 %v1543_v40, %v353_v38 }
  0xa4   :  { %vm101_vm2 = vcmp.ne.s32.totalorder %v85_v8, 0  ;;  %vm149_vm3 = vcmp.ne.s32.totalorder %v85_v8, 7  ;;  %v534_v36 = vmul.f32 %v1510_v18, %v1908_v29  ;;  %v678_v62 = vadd.f32 %v662_v28, %v642_v33 }
  0xa5   :  { %v699_v34 = vadd.f32 %v1602_v6, %v585_v59  ;;  %v1983_v55 = vsel %vm101_vm2, 1.0, %v2486_v32  ;;  %v1986_v24 = vsel %vm149_vm3, 1.0, %v2486_v32  ;;  %v457_v53 = vadd.f32 %v441_v58, %v421_v5 }
  0xa6   :  { %v354_v2 = vmul.f32 %v1983_v55, %v325_v23  ;;  %v403_v9 = vmul.f32 %v1986_v24, %v373_v21  ;;  %v550_v10 = vadd.f32 %v534_v36, %v514_v45  ;;  %v570_v20 = vmul.f32 %v1545_v41, %v402_v37 }
  0xa7   :  { %v731_v22 = vadd.f32 %v699_v34, %v492_v31  ;;  %v627_v28 = vmul.f32 %v1562_v48, %v1521_v25  ;;  %v422_v42 = vmul.f32 %v1541_v39, %v353_v38  ;;  %v493_v30 = vadd.f32 %v477_v44, %v457_v53 }
  0xa8   :  { %v607_v8 = vmul.f32 %v1560_v47, %v354_v2  ;;  %v663_v32 = vmul.f32 %v1585_v57, %v403_v9  ;;  %v442_v23 = vmul.f32 %v1494_v13, %v1908_v29  ;;  %v586_v21 = vadd.f32 %v570_v20, %v550_v10 }
  0xa9   :  { %v763_v43 = vadd.f32 %v731_v22, %v678_v62  ;;  %v478_v5 = vmul.f32 %v1558_v46, %v402_v37  ;;  %v515_v31 = vmul.f32 %v1543_v40, %v354_v2  ;;  %v535_v58 = vmul.f32 %v1510_v18, %v1521_v25 }
  0xaa   :  { %v643_v59 = vadd.f32 %v627_v28, %v607_v8  ;;  %v458_v33 = vadd.f32 %v442_v23, %v422_v42  ;;  %v571_v44 = vmul.f32 %v1545_v41, %v403_v9  ;;  %v700_v38 = vadd.f32 %v1602_v6, %v586_v21 }
  0xab   :  { %779 = vst [vmem:[#allocation8 + $0x60] sm:$0xff] %v763_v43  ;;  %v608_v45 = vmul.f32 %v1560_v47, %v1568_v50  ;;  %v628_v29 = vmul.f32 %v1562_v48, %v1523_v26  ;;  %v664_v37 = vmul.f32 %v1585_v57, %v1579_v54  ;;  %v551_v34 = vadd.f32 %v535_v58, %v515_v31  ;;  %v2020_v43 = vld [vmem:[#allocation2 + $0x80] sm:$0xff] }
  0xac   :  { %v679_v36 = vadd.f32 %v663_v32, %v643_v59  ;;  %v494_v62 = vadd.f32 %v478_v5, %v458_v33  ;;  %v423_v53 = vmul.f32 %v1541_v39, %v354_v2  ;;  %v732_v10 = vadd.f32 %v700_v38, %v493_v30  ;;  %v2022_v2 = vld [vmem:[#allocation2 + $0x88] sm:$0xff]  ;;  %v2024_v30 = vld [vmem:[#allocation2 + $0xf0] sm:$0xff]  ;;  %v2028_v5 = vld [vmem:[#allocation2 + $0xf8] sm:$0xff] }
  0xad   :  { %v644_v22 = vadd.f32 %v628_v29, %v608_v45  ;;  %v443_v20 = vmul.f32 %v1494_v13, %v1521_v25  ;;  %v479_v28 = vmul.f32 %v1558_v46, %v403_v9  ;;  %v587_v42 = vadd.f32 %v571_v44, %v551_v34  ;;  %v2038_v38 = vld [vmem:[#allocation2 + $0x90] sm:$0xff] }
  0xae   :  { %v516_v8 = vmul.f32 %v1543_v40, %v1568_v50  ;;  %v536_v23 = vmul.f32 %v1510_v18, %v1523_v26  ;;  %v572_v32 = vmul.f32 %v1545_v41, %v1579_v54  ;;  %v764_v21 = vadd.f32 %v732_v10, %v679_v36 }
  0xaf   :  { %v680_v13 = vadd.f32 %v664_v37, %v644_v22  ;;  %v459_v25 = vadd.f32 %v443_v20, %v423_v53  ;;  %v593_v9 = vmul.f32 %v1560_v47, %v1565_v49  ;;  %v701_v50 = vadd.f32 %v1602_v6, %v587_v42 }
  0xb0   :  { %v552_v18 = vadd.f32 %v536_v23, %v516_v8  ;;  %v613_v26 = vmul.f32 %v1562_v48, %v1512_v19  ;;  %v649_v41 = vmul.f32 %v1585_v57, %v1575_v52  ;;  %780 = vst [vmem:[#allocation8 + $0x68] sm:$0xff] %v764_v21  ;;  %v800_v31 = vrot.slane %v2020_v43, 7 }
  0xb1   :  { %v495_v54 = vadd.f32 %v479_v28, %v459_v25  ;;  %v801_v59 = vrot.slane %v2022_v2, 7  ;;  %v814_v33 = vrot.slane %v2024_v30, 7  ;;  %v733_v49 = vadd.f32 %v701_v50, %v494_v62  ;;  %v2080_v50 = vld [vmem:[#allocation5 + $0x1] ss:$0 sm:$0xff] }
  0xb2   :  { %v588_v58 = vadd.f32 %v572_v32, %v552_v18  ;;  %v629_v44 = vadd.f32 %v613_v26, %v593_v9  ;;  %v815_v45 = vrot.slane %v2028_v5, 7  ;;  %v848_v52 = vrot.slane %v2020_v43, 1 }
  0xb3   :  { %v830_v19 = vsel %vm323_vm6, %v800_v31, %v801_v59  ;;  %v849_v29 = vrot.slane %v2022_v2, 1  ;;  %v850_v37 = vrot.slane %v2038_v38, 1  ;;  %v765_v36 = vadd.f32 %v733_v49, %v680_v13 }
  0xb4   :  { %v665_v34 = vadd.f32 %v649_v41, %v629_v44  ;;  %v702_v53 = vadd.f32 %v1602_v6, %v588_v58  ;;  %v816_v62 = vsel %vm323_vm6, %v814_v33, %v815_v45  ;;  %v831_v10 = vsel %vm323_vm6, %v815_v45, %v800_v31  ;;  %v2086_v41 = vld [vmem:[#allocation5 + $0x5] ss:$0 sm:$0xff]  ;;  %v2096_v31 = vld [vmem:[#allocation5 + $0x6] ss:$0 sm:$0xff]  ;;  %v2101_v58 = vld [vmem:[#allocation2 + $0x98] sm:$0xff] }
  0xb5   :  { %v2054_v22 = vmul.f32 %v1499_v14, %v830_v19  ;;  %v2057_v20 = vmul.f32 %v1502_v15, %v816_v62  ;;  %v863_v28 = vrot.slane %v2028_v5, 1  ;;  %781 = vst [vmem:[#allocation8 + $0x70] sm:$0xff] %v765_v36  ;;  %v2061_v23 = vmul.f32 %v1489_v11, %v831_v10  ;;  %v2111_v36 = vld [vmem:[#allocation5 + $0x2] ss:$0 sm:$0xff] }
  0xb6   :  { %v734_v42 = vadd.f32 %v702_v53, %v495_v54  ;;  %v750_v8 = vmul.f32 0.0, %v665_v34  ;;  %v877_v32 = vsel %vm372_vm7, %v849_v29, %v850_v37  ;;  %v878_v21 = vsel %vm372_vm7, %v848_v52, %v849_v29 }
  0xb7   :  { %v879_v14 = vsel %vm372_vm7, %v863_v28, %v848_v52  ;;  %v881_v15 = vmul.f32 %v1505_v16, %v877_v32  ;;  %v911_v13 = vmul.f32 %v1541_v39, %v2057_v20  ;;  %v2075_v11 = vmul.f32 %v1492_v12, %v878_v21  ;;  %v2105_v52 = vld [vmem:[#allocation5] ss:$0 sm:$0xff] }
  0xb8   :  { %v766_v25 = vadd.f32 %v750_v8, %v734_v42  ;;  %v2078_v9 = vmul.f32 %v1508_v17, %v879_v14  ;;  %v927_v18 = vmul.f32 %v2080_v50, %v2028_v5  ;;  %v976_v26 = vmul.f32 %v1543_v40, %v2061_v23 }
  0xb9   :  { %v992_v16 = vmul.f32 %v2086_v41, %v2020_v43  ;;  %v1057_v12 = vmul.f32 %v1560_v47, %v2054_v22  ;;  %v1073_v17 = vmul.f32 %v1562_v48, %v2022_v2  ;;  %v1024_v40 = vmul.f32 %v2096_v31, %v2075_v11 }
  0xba   :  { %782 = vst [vmem:[#allocation8 + $0x78] sm:$0xff] %v766_v25  ;;  %v943_v39 = vadd.f32 %v927_v18, %v911_v13  ;;  %v959_v54 = vmul.f32 %v1558_v46, %v2078_v9  ;;  %v1105_v49 = vmul.f32 %v1585_v57, %v881_v15  ;;  %v802_v47 = vrot.slane %v2038_v38, 7  ;;  %v2122_v13 = vld [vmem:[#allocation5 + $0x4] ss:$0 sm:$0xff] }
  0xbb   :  { %v1008_v44 = vadd.f32 %v992_v16, %v976_v26  ;;  %v1089_v45 = vadd.f32 %v1073_v17, %v1057_v12  ;;  %v851_v48 = vrot.slane %v2101_v58, 1  ;;  %v896_v46 = vmul.f32 %v2105_v52, %v2061_v23  ;;  %v2132_v16 = vld [vmem:[#allocation5 + $0x9] ss:$0 sm:$0xff]  ;;  %v2139_v17 = vld [vmem:[#allocation2 + $0xa0] sm:$0xff] }
  0xbc   :  { %v975_v19 = vadd.f32 %v959_v54, %v943_v39  ;;  %v912_v29 = vmul.f32 %v2080_v50, %v2020_v43  ;;  %v944_v57 = vmul.f32 %v2111_v36, %v2075_v11  ;;  %v829_v62 = vsel %vm323_vm6, %v801_v59, %v802_v47 }
  0xbd   :  { %v1040_v34 = vadd.f32 %v1024_v40, %v1008_v44  ;;  %v1121_v53 = vadd.f32 %v1105_v49, %v1089_v45  ;;  %v876_v10 = vsel %vm372_vm7, %v850_v37, %v851_v48  ;;  %v834_v8 = vmul.f32 %v1597_v0, %v829_v62  ;;  %v2129_v37 = vld [vmem:[#allocation5 + $0x8] ss:$0 sm:$0xff] }
  0xbe   :  { %v1152_v42 = vmul.f32 0.0, %v975_v19  ;;  %v882_v32 = vmul.f32 %v1605_v27, %v876_v10  ;;  %v928_v21 = vadd.f32 %v912_v29, %v896_v46  ;;  %v977_v25 = vmul.f32 %v2122_v13, %v2054_v22  ;;  %v2136_v27 = vld [vmem:[#allocation5 + $0xa] ss:$0 sm:$0xff] }
  0xbf   :  { %v1136_v14 = vadd.f32 %v1602_v6, %v1040_v34  ;;  %v993_v18 = vmul.f32 %v2086_v41, %v2022_v2  ;;  %v1025_v59 = vmul.f32 %v2096_v31, %v881_v15  ;;  %v1058_v0 = vmul.f32 %v2129_v37, %v834_v8 }
  0xc0   :  { %v960_v26 = vadd.f32 %v944_v57, %v928_v21  ;;  %v1074_v6 = vmul.f32 %v2132_v16, %v2038_v38  ;;  %v1106_v12 = vmul.f32 %v2136_v27, %v882_v32  ;;  %v803_v40 = vrot.slane %v2101_v58, 7 }
  0xc1   :  { %v1168_v39 = vadd.f32 %v1152_v42, %v1136_v14  ;;  %v1009_v54 = vadd.f32 %v993_v18, %v977_v25  ;;  %v852_v49 = vrot.slane %v2139_v17, 1  ;;  %v897_v45 = vmul.f32 %v2105_v52, %v2054_v22  ;;  %v2154_v22 = vld [vmem:[#allocation7] ss:$0 sm:$0xff] }
  0xc2   :  { %v1090_v44 = vadd.f32 %v1074_v6, %v1058_v0  ;;  %v913_v19 = vmul.f32 %v2080_v50, %v2022_v2  ;;  %v945_v46 = vmul.f32 %v2111_v36, %v881_v15  ;;  %v828_v34 = vsel %vm323_vm6, %v802_v47, %v803_v40  ;;  %v2165_v18 = vld [vmem:[#allocation2 + $0xa8] sm:$0xff] }
  0xc3   :  { %v1200_v29 = vadd.f32 %v1168_v39, %v1121_v53  ;;  %v1041_v57 = vadd.f32 %v1025_v59, %v1009_v54  ;;  %v875_v62 = vsel %vm372_vm7, %v851_v48, %v852_v49  ;;  %v835_v42 = vmul.f32 %v1633_v3, %v828_v34 }
  0xc4   :  { %v1122_v10 = vadd.f32 %v1106_v12, %v1090_v44  ;;  %v883_v21 = vmul.f32 %v1640_v35, %v875_v62  ;;  %v929_v14 = vadd.f32 %v913_v19, %v897_v45  ;;  %v978_v15 = vmul.f32 %v2122_v13, %v834_v8 }
  0xc5   :  { %1217 = vst [vmem:[#allocation8 + $0x80] sm:$0xff] %v1200_v29  ;;  %v1137_v2 = vadd.f32 %v2154_v22, %v1041_v57  ;;  %v994_v53 = vmul.f32 %v2086_v41, %v2038_v38  ;;  %v1026_v47 = vmul.f32 %v2096_v31, %v882_v32  ;;  %v1059_v48 = vmul.f32 %v2129_v37, %v835_v42 }
  0xc6   :  { %v961_v25 = vadd.f32 %v945_v46, %v929_v14  ;;  %v1075_v3 = vmul.f32 %v2132_v16, %v2101_v58  ;;  %v1107_v35 = vmul.f32 %v2136_v27, %v883_v21  ;;  %v804_v6 = vrot.slane %v2139_v17, 7 }
  0xc7   :  { %v1169_v59 = vadd.f32 %v1137_v2, %v960_v26  ;;  %v1010_v0 = vadd.f32 %v994_v53, %v978_v15  ;;  %v853_v12 = vrot.slane %v2165_v18, 1  ;;  %v898_v54 = vmul.f32 %v2105_v52, %v834_v8 }
  0xc8   :  { %v1091_v39 = vadd.f32 %v1075_v3, %v1059_v48  ;;  %v914_v44 = vmul.f32 %v2080_v50, %v2038_v38  ;;  %v946_v45 = vmul.f32 %v2111_v36, %v882_v32  ;;  %v827_v29 = vsel %vm323_vm6, %v803_v40, %v804_v6 }
  0xc9   :  { %v1201_v19 = vadd.f32 %v1169_v59, %v1122_v10  ;;  %v1042_v46 = vadd.f32 %v1026_v47, %v1010_v0  ;;  %v874_v26 = vsel %vm372_vm7, %v852_v49, %v853_v12  ;;  %v836_v34 = vmul.f32 %v1667_v63, %v827_v29 }
  0xca   :  { %v1123_v57 = vadd.f32 %v1107_v35, %v1091_v39  ;;  %v884_v62 = vmul.f32 %v1675_v61, %v874_v26  ;;  %v930_v14 = vadd.f32 %v914_v44, %v898_v54  ;;  %v979_v38 = vmul.f32 %v2122_v13, %v835_v42  ;;  %v2188_v61 = vld [vmem:[#allocation2 + $0xb0] sm:$0xff] }
  0xcb   :  { %1218 = vst [vmem:[#allocation8 + $0x88] sm:$0xff] %v1201_v19  ;;  %v1138_v8 = vadd.f32 %v2154_v22, %v1042_v46  ;;  %v995_v32 = vmul.f32 %v2086_v41, %v2101_v58  ;;  %v1027_v10 = vmul.f32 %v2096_v31, %v883_v21  ;;  %v1060_v2 = vmul.f32 %v2129_v37, %v836_v34 }
  0xcc   :  { %v962_v40 = vadd.f32 %v946_v45, %v930_v14  ;;  %v1076_v49 = vmul.f32 %v2132_v16, %v2139_v17  ;;  %v1108_v63 = vmul.f32 %v2136_v27, %v884_v62  ;;  %v805_v47 = vrot.slane %v2165_v18, 7 }
  0xcd   :  { %v1170_v15 = vadd.f32 %v1138_v8, %v961_v25  ;;  %v1011_v53 = vadd.f32 %v995_v32, %v979_v38  ;;  %v854_v48 = vrot.slane %v2188_v61, 1  ;;  %v899_v35 = vmul.f32 %v2105_v52, %v835_v42 }
  0xce   :  { %v1092_v3 = vadd.f32 %v1076_v49, %v1060_v2  ;;  %v915_v59 = vmul.f32 %v2080_v50, %v2101_v58  ;;  %v947_v0 = vmul.f32 %v2111_v36, %v883_v21  ;;  %v826_v44 = vsel %vm323_vm6, %v804_v6, %v805_v47 }
  0xcf   :  { %v1202_v39 = vadd.f32 %v1170_v15, %v1123_v57  ;;  %v1043_v54 = vadd.f32 %v1027_v10, %v1011_v53  ;;  %v873_v25 = vsel %vm372_vm7, %v853_v12, %v854_v48  ;;  %v837_v19 = vmul.f32 %v1712_v56, %v826_v44 }
  0xd0   :  { %v1124_v45 = vadd.f32 %v1108_v63, %v1092_v3  ;;  %v885_v46 = vmul.f32 %v1715_v4, %v873_v25  ;;  %v931_v29 = vadd.f32 %v915_v59, %v899_v35  ;;  %v980_v58 = vmul.f32 %v2122_v13, %v836_v34  ;;  %v2211_v4 = vld [vmem:[#allocation2 + $0xb8] sm:$0xff] }
  0xd1   :  { %1219 = vst [vmem:[#allocation8 + $0x90] sm:$0xff] %v1202_v39  ;;  %v1139_v42 = vadd.f32 %v2154_v22, %v1043_v54  ;;  %v996_v21 = vmul.f32 %v2086_v41, %v2139_v17  ;;  %v1028_v26 = vmul.f32 %v2096_v31, %v884_v62  ;;  %v1061_v57 = vmul.f32 %v2129_v37, %v837_v19 }
  0xd2   :  { %v963_v6 = vadd.f32 %v947_v0, %v931_v29  ;;  %v1077_v12 = vmul.f32 %v2132_v16, %v2165_v18  ;;  %v1109_v56 = vmul.f32 %v2136_v27, %v885_v46  ;;  %v806_v38 = vrot.slane %v2188_v61, 7  ;;  %v2501_v0 = vld [vmem:[#allocation12_spill] sm:$0xff] }
  0xd3   :  { %v1171_v14 = vadd.f32 %v1139_v42, %v962_v40  ;;  %v1012_v8 = vadd.f32 %v996_v21, %v980_v58  ;;  %v855_v32 = vrot.slane %v2211_v4, 1  ;;  %v900_v2 = vmul.f32 %v2105_v52, %v836_v34 }
  0xd4   :  { %v1093_v10 = vadd.f32 %v1077_v12, %v1061_v57  ;;  %v916_v49 = vmul.f32 %v2080_v50, %v2139_v17  ;;  %v948_v63 = vmul.f32 %v2111_v36, %v884_v62  ;;  %v825_v3 = vsel %vm323_vm6, %v805_v47, %v806_v38 }
  0xd5   :  { %v1203_v15 = vadd.f32 %v1171_v14, %v1124_v45  ;;  %v1044_v53 = vadd.f32 %v1028_v26, %v1012_v8  ;;  %v872_v40 = vsel %vm372_vm7, %v854_v48, %v855_v32  ;;  %v838_v59 = vmul.f32 %v1742_v51, %v825_v3  ;;  %v2234_v45 = vld [vmem:[#allocation2 + $0xc0] sm:$0xff] }
  0xd6   :  { %v1125_v35 = vadd.f32 %v1109_v56, %v1093_v10  ;;  %v886_v39 = vmul.f32 %v2501_v0, %v872_v40  ;;  %v932_v54 = vadd.f32 %v916_v49, %v900_v2  ;;  %v981_v17 = vmul.f32 %v2122_v13, %v837_v19  ;;  %v2502_v49 = vld [vmem:[#allocation13_spill] sm:$0xff] }
  0xd7   :  { %1220 = vst [vmem:[#allocation8 + $0x98] sm:$0xff] %v1203_v15  ;;  %v1140_v34 = vadd.f32 %v2154_v22, %v1044_v53  ;;  %v997_v62 = vmul.f32 %v2086_v41, %v2165_v18  ;;  %v1029_v44 = vmul.f32 %v2096_v31, %v885_v46  ;;  %v1062_v25 = vmul.f32 %v2129_v37, %v838_v59  ;;  %v2503_v15 = vld [vmem:[#allocation14_spill] sm:$0xff] }
  0xd8   :  { %v964_v47 = vadd.f32 %v948_v63, %v932_v54  ;;  %v1078_v48 = vmul.f32 %v2132_v16, %v2188_v61  ;;  %v1110_v51 = vmul.f32 %v2136_v27, %v886_v39  ;;  %v807_v58 = vrot.slane %v2211_v4, 7  ;;  %v2257_v54 = vld [vmem:[#allocation2 + $0xc8] sm:$0xff] }
  0xd9   :  { %v1172_v29 = vadd.f32 %v1140_v34, %v963_v6  ;;  %v1013_v42 = vadd.f32 %v997_v62, %v981_v17  ;;  %v856_v21 = vrot.slane %v2234_v45, 1  ;;  %v901_v57 = vmul.f32 %v2105_v52, %v837_v19 }
  0xda   :  { %v1094_v26 = vadd.f32 %v1078_v48, %v1062_v25  ;;  %v917_v12 = vmul.f32 %v2080_v50, %v2165_v18  ;;  %v949_v56 = vmul.f32 %v2111_v36, %v885_v46  ;;  %v824_v10 = vsel %vm323_vm6, %v806_v38, %v807_v58 }
  0xdb   :  { %v1204_v14 = vadd.f32 %v1172_v29, %v1125_v35  ;;  %v1045_v8 = vadd.f32 %v1029_v44, %v1013_v42  ;;  %v871_v6 = vsel %vm372_vm7, %v855_v32, %v856_v21  ;;  %v839_v63 = vmul.f32 %v2502_v49, %v824_v10 }
  0xdc   :  { %v1126_v2 = vadd.f32 %v1110_v51, %v1094_v26  ;;  %v887_v53 = vmul.f32 %v2503_v15, %v871_v6  ;;  %v933_v3 = vadd.f32 %v917_v12, %v901_v57  ;;  %v982_v18 = vmul.f32 %v2122_v13, %v838_v59 }
  0xdd   :  { %1221 = vst [vmem:[#allocation8 + $0xa0] sm:$0xff] %v1204_v14  ;;  %v1141_v19 = vadd.f32 %v2154_v22, %v1045_v8  ;;  %v998_v46 = vmul.f32 %v2086_v41, %v2188_v61  ;;  %v1030_v40 = vmul.f32 %v2096_v31, %v886_v39  ;;  %v1063_v35 = vmul.f32 %v2129_v37, %v839_v63  ;;  %v2505_v8 = vld [vmem:[#allocation16_spill] sm:$0xff] }
  0xde   :  { %v965_v38 = vadd.f32 %v949_v56, %v933_v3  ;;  %v1079_v32 = vmul.f32 %v2132_v16, %v2211_v4  ;;  %v1111_v0 = vmul.f32 %v2136_v27, %v887_v53  ;;  %v808_v62 = vrot.slane %v2234_v45, 7  ;;  %v2504_v56 = vld [vmem:[#allocation15_spill] sm:$0xff]  ;;  %v2280_v3 = vld [vmem:[#allocation2 + $0xd0] sm:$0xff] }
  0xdf   :  { %v1173_v34 = vadd.f32 %v1141_v19, %v964_v47  ;;  %v1014_v17 = vadd.f32 %v998_v46, %v982_v18  ;;  %v857_v44 = vrot.slane %v2257_v54, 1  ;;  %v902_v48 = vmul.f32 %v2105_v52, %v838_v59 }
  0xe0   :  { %v1095_v25 = vadd.f32 %v1079_v32, %v1063_v35  ;;  %v918_v51 = vmul.f32 %v2080_v50, %v2188_v61  ;;  %v950_v29 = vmul.f32 %v2111_v36, %v886_v39  ;;  %v823_v57 = vsel %vm323_vm6, %v807_v58, %v808_v62 }
  0xe1   :  { %v1205_v42 = vadd.f32 %v1173_v34, %v1126_v2  ;;  %v1046_v26 = vadd.f32 %v1030_v40, %v1014_v17  ;;  %v870_v47 = vsel %vm372_vm7, %v856_v21, %v857_v44  ;;  %v840_v14 = vmul.f32 %v2504_v56, %v823_v57 }
  0xe2   :  { %v1127_v12 = vadd.f32 %v1111_v0, %v1095_v25  ;;  %v888_v10 = vmul.f32 %v2505_v8, %v870_v47  ;;  %v934_v6 = vadd.f32 %v918_v51, %v902_v48  ;;  %v983_v61 = vmul.f32 %v2122_v13, %v839_v63 }
  0xe3   :  { %1222 = vst [vmem:[#allocation8 + $0xa8] sm:$0xff] %v1205_v42  ;;  %v1142_v59 = vadd.f32 %v2154_v22, %v1046_v26  ;;  %v999_v39 = vmul.f32 %v2086_v41, %v2211_v4  ;;  %v1031_v2 = vmul.f32 %v2096_v31, %v887_v53  ;;  %v1064_v49 = vmul.f32 %v2129_v37, %v840_v14  ;;  %v2507_v26 = vld [vmem:[#allocation18_spill] sm:$0xff] }
  0xe4   :  { %v966_v58 = vadd.f32 %v950_v29, %v934_v6  ;;  %v1080_v21 = vmul.f32 %v2132_v16, %v2234_v45  ;;  %v1112_v15 = vmul.f32 %v2136_v27, %v888_v10  ;;  %v809_v46 = vrot.slane %v2257_v54, 7  ;;  %v2506_v29 = vld [vmem:[#allocation17_spill] sm:$0xff] }
  0xe5   :  { %v1174_v19 = vadd.f32 %v1142_v59, %v965_v38  ;;  %v1015_v18 = vadd.f32 %v999_v39, %v983_v61  ;;  %v858_v40 = vrot.slane %v2280_v3, 1  ;;  %v903_v32 = vmul.f32 %v2105_v52, %v839_v63  ;;  %v2303_v6 = vld [vmem:[#allocation2 + $0xd8] sm:$0xff] }
  0xe6   :  { %v1096_v35 = vadd.f32 %v1080_v21, %v1064_v49  ;;  %v919_v0 = vmul.f32 %v2080_v50, %v2211_v4  ;;  %v951_v34 = vmul.f32 %v2111_v36, %v887_v53  ;;  %v822_v48 = vsel %vm323_vm6, %v808_v62, %v809_v46 }
  0xe7   :  { %v1206_v17 = vadd.f32 %v1174_v19, %v1127_v12  ;;  %v1047_v25 = vadd.f32 %v1031_v2, %v1015_v18  ;;  %v869_v38 = vsel %vm372_vm7, %v857_v44, %v858_v40  ;;  %v841_v42 = vmul.f32 %v2506_v29, %v822_v48 }
  0xe8   :  { %v1128_v51 = vadd.f32 %v1112_v15, %v1096_v35  ;;  %v889_v57 = vmul.f32 %v2507_v26, %v869_v38  ;;  %v935_v47 = vadd.f32 %v919_v0, %v903_v32  ;;  %v984_v4 = vmul.f32 %v2122_v13, %v840_v14 }
  0xe9   :  { %1223 = vst [vmem:[#allocation8 + $0xb0] sm:$0xff] %v1206_v17  ;;  %v1143_v63 = vadd.f32 %v2154_v22, %v1047_v25  ;;  %v1000_v53 = vmul.f32 %v2086_v41, %v2234_v45  ;;  %v1032_v12 = vmul.f32 %v2096_v31, %v888_v10  ;;  %v1065_v56 = vmul.f32 %v2129_v37, %v841_v42  ;;  %v2509_v25 = vld [vmem:[#allocation20_spill] sm:$0xff] }
  0xea   :  { %v967_v62 = vadd.f32 %v951_v34, %v935_v47  ;;  %v1081_v44 = vmul.f32 %v2132_v16, %v2257_v54  ;;  %v1113_v8 = vmul.f32 %v2136_v27, %v889_v57  ;;  %v810_v39 = vrot.slane %v2280_v3, 7  ;;  %v2508_v34 = vld [vmem:[#allocation19_spill] sm:$0xff] }
  0xeb   :  { %v1175_v59 = vadd.f32 %v1143_v63, %v966_v58  ;;  %v1016_v61 = vadd.f32 %v1000_v53, %v984_v4  ;;  %v859_v2 = vrot.slane %v2303_v6, 1  ;;  %v904_v21 = vmul.f32 %v2105_v52, %v840_v14  ;;  %v2326_v47 = vld [vmem:[#allocation2 + $0xe0] sm:$0xff] }
  0xec   :  { %v1097_v49 = vadd.f32 %v1081_v44, %v1065_v56  ;;  %v920_v15 = vmul.f32 %v2080_v50, %v2234_v45  ;;  %v952_v19 = vmul.f32 %v2111_v36, %v888_v10  ;;  %v821_v32 = vsel %vm323_vm6, %v809_v46, %v810_v39 }
  0xed   :  { %v1207_v18 = vadd.f32 %v1175_v59, %v1128_v51  ;;  %v1048_v35 = vadd.f32 %v1032_v12, %v1016_v61  ;;  %v868_v58 = vsel %vm372_vm7, %v858_v40, %v859_v2  ;;  %v842_v17 = vmul.f32 %v2508_v34, %v821_v32  ;;  %v2349_v34 = vld [vmem:[#allocation2 + $0xe8] sm:$0xff] }
  0xee   :  { %v1129_v0 = vadd.f32 %v1113_v8, %v1097_v49  ;;  %v890_v48 = vmul.f32 %v2509_v25, %v868_v58  ;;  %v936_v38 = vadd.f32 %v920_v15, %v904_v21  ;;  %v985_v45 = vmul.f32 %v2122_v13, %v841_v42 }
  0xef   :  { %1224 = vst [vmem:[#allocation8 + $0xb8] sm:$0xff] %v1207_v18  ;;  %v1144_v14 = vadd.f32 %v2154_v22, %v1048_v35  ;;  %v1001_v10 = vmul.f32 %v2086_v41, %v2257_v54  ;;  %v1033_v51 = vmul.f32 %v2096_v31, %v889_v57  ;;  %v1066_v29 = vmul.f32 %v2129_v37, %v842_v17  ;;  %v2510_v18 = vld [vmem:[#allocation21_spill] sm:$0xff] }
  0xf0   :  { %v968_v46 = vadd.f32 %v952_v19, %v936_v38  ;;  %v1082_v40 = vmul.f32 %v2132_v16, %v2280_v3  ;;  %v1114_v26 = vmul.f32 %v2136_v27, %v890_v48  ;;  %v811_v53 = vrot.slane %v2303_v6, 7 }
  0xf1   :  { %v1176_v63 = vadd.f32 %v1144_v14, %v967_v62  ;;  %v1017_v4 = vadd.f32 %v1001_v10, %v985_v45  ;;  %v860_v12 = vrot.slane %v2326_v47, 1  ;;  %v905_v44 = vmul.f32 %v2105_v52, %v841_v42 }
  0xf2   :  { %v1098_v56 = vadd.f32 %v1082_v40, %v1066_v29  ;;  %v921_v8 = vmul.f32 %v2080_v50, %v2257_v54  ;;  %v953_v59 = vmul.f32 %v2111_v36, %v889_v57  ;;  %v820_v21 = vsel %vm323_vm6, %v810_v39, %v811_v53 }
  0xf3   :  { %v1208_v61 = vadd.f32 %v1176_v63, %v1129_v0  ;;  %v1049_v49 = vadd.f32 %v1033_v51, %v1017_v4  ;;  %v867_v62 = vsel %vm372_vm7, %v859_v2, %v860_v12  ;;  %v843_v19 = vmul.f32 %v1892_v60, %v820_v21 }
  0xf4   :  { %v1130_v15 = vadd.f32 %v1114_v26, %v1098_v56  ;;  %v891_v35 = vmul.f32 %v2510_v18, %v867_v62  ;;  %v937_v32 = vadd.f32 %v921_v8, %v905_v44  ;;  %v986_v54 = vmul.f32 %v2122_v13, %v842_v17  ;;  %v2511_v44 = vld [vmem:[#allocation22_spill] sm:$0xff] }
  0xf5   :  { %1225 = vst [vmem:[#allocation8 + $0xc0] sm:$0xff] %v1208_v61  ;;  %v1145_v42 = vadd.f32 %v2154_v22, %v1049_v49  ;;  %v1002_v57 = vmul.f32 %v2086_v41, %v2280_v3  ;;  %v1034_v58 = vmul.f32 %v2096_v31, %v890_v48  ;;  %v1067_v0 = vmul.f32 %v2129_v37, %v843_v19 }
  0xf6   :  { %v969_v39 = vadd.f32 %v953_v59, %v937_v32  ;;  %v1083_v2 = vmul.f32 %v2132_v16, %v2303_v6  ;;  %v1115_v60 = vmul.f32 %v2136_v27, %v891_v35  ;;  %v812_v14 = vrot.slane %v2326_v47, 7  ;;  %v2512_v59 = vld [vmem:[#allocation23_spill] sm:$0xff] }
  0xf7   :  { %v1177_v25 = vadd.f32 %v1145_v42, %v968_v46  ;;  %v1018_v38 = vadd.f32 %v1002_v57, %v986_v54  ;;  %v861_v45 = vrot.slane %v2349_v34, 1  ;;  %v906_v51 = vmul.f32 %v2105_v52, %v842_v17 }
  0xf8   :  { %v1099_v10 = vadd.f32 %v1083_v2, %v1067_v0  ;;  %v922_v29 = vmul.f32 %v2080_v50, %v2280_v3  ;;  %v954_v40 = vmul.f32 %v2111_v36, %v890_v48  ;;  %v819_v4 = vsel %vm323_vm6, %v811_v53, %v812_v14 }
  0xf9   :  { %v1209_v26 = vadd.f32 %v1177_v25, %v1130_v15  ;;  %v1050_v63 = vadd.f32 %v1034_v58, %v1018_v38  ;;  %v866_v46 = vsel %vm372_vm7, %v860_v12, %v861_v45  ;;  %v844_v8 = vmul.f32 %v2511_v44, %v819_v4 }
  0xfa   :  { %v1131_v56 = vadd.f32 %v1115_v60, %v1099_v10  ;;  %v892_v61 = vmul.f32 %v2512_v59, %v866_v46  ;;  %v938_v49 = vadd.f32 %v922_v29, %v906_v51  ;;  %v987_v3 = vmul.f32 %v2122_v13, %v843_v19  ;;  %v2513_v29 = vld [vmem:[#allocation24_spill] sm:$0xff] }
  0xfb   :  { %1226 = vst [vmem:[#allocation8 + $0xc8] sm:$0xff] %v1209_v26  ;;  %v1146_v17 = vadd.f32 %v2154_v22, %v1050_v63  ;;  %v1003_v48 = vmul.f32 %v2086_v41, %v2303_v6  ;;  %v1035_v21 = vmul.f32 %v2096_v31, %v891_v35  ;;  %v1068_v62 = vmul.f32 %v2129_v37, %v844_v8 }
  0xfc   :  { %v970_v53 = vadd.f32 %v954_v40, %v938_v49  ;;  %v1084_v12 = vmul.f32 %v2132_v16, %v2326_v47  ;;  %v1116_v15 = vmul.f32 %v2136_v27, %v892_v61  ;;  %v813_v42 = vrot.slane %v2349_v34, 7 }
  0xfd   :  { %v1178_v18 = vadd.f32 %v1146_v17, %v969_v39  ;;  %v1019_v32 = vadd.f32 %v1003_v48, %v987_v3  ;;  %v862_v54 = vrot.slane %v2024_v30, 1  ;;  %v907_v58 = vmul.f32 %v2105_v52, %v843_v19 }
  0xfe   :  { %v1100_v57 = vadd.f32 %v1084_v12, %v1068_v62  ;;  %v923_v0 = vmul.f32 %v2080_v50, %v2303_v6  ;;  %v955_v2 = vmul.f32 %v2111_v36, %v891_v35  ;;  %v818_v38 = vsel %vm323_vm6, %v812_v14, %v813_v42 }
  0xff   :  { %v1210_v60 = vadd.f32 %v1178_v18, %v1131_v56  ;;  %v1051_v25 = vadd.f32 %v1035_v21, %v1019_v32  ;;  %v865_v39 = vsel %vm372_vm7, %v861_v45, %v862_v54  ;;  %v845_v51 = vmul.f32 %v1950_v7, %v818_v38 }
 0x100   :  { %v1132_v10 = vadd.f32 %v1116_v15, %v1100_v57  ;;  %v893_v40 = vmul.f32 %v2513_v29, %v865_v39  ;;  %v939_v26 = vadd.f32 %v923_v0, %v907_v58  ;;  %v988_v6 = vmul.f32 %v2122_v13, %v844_v8 }
 0x101   :  { %1227 = vst [vmem:[#allocation8 + $0xd0] sm:$0xff] %v1210_v60  ;;  %v1147_v19 = vadd.f32 %v2154_v22, %v1051_v25  ;;  %v1004_v35 = vmul.f32 %v2086_v41, %v2326_v47  ;;  %v1036_v63 = vmul.f32 %v2096_v31, %v892_v61  ;;  %v1069_v4 = vmul.f32 %v2129_v37, %v845_v51 }
 0x102   :  { %v971_v14 = vadd.f32 %v955_v2, %v939_v26  ;;  %v1085_v45 = vmul.f32 %v2132_v16, %v2349_v34  ;;  %v1117_v7 = vmul.f32 %v2136_v27, %v893_v40  ;;  %v817_v44 = vsel %vm323_vm6, %v813_v42, %v814_v33 }
 0x103   :  { %v1179_v46 = vadd.f32 %v1147_v19, %v970_v53  ;;  %v1020_v56 = vadd.f32 %v1004_v35, %v988_v6  ;;  %v864_v59 = vsel %vm372_vm7, %v862_v54, %v863_v28  ;;  %v846_v17 = vmul.f32 %v1983_v55, %v817_v44 }
 0x104   :  { %v1101_v49 = vadd.f32 %v1085_v45, %v1069_v4  ;;  %v894_v3 = vmul.f32 %v1986_v24, %v864_v59  ;;  %v908_v48 = vmul.f32 %v2105_v52, %v844_v8  ;;  %v924_v62 = vmul.f32 %v2080_v50, %v2326_v47 }
 0x105   :  { %v1211_v21 = vadd.f32 %v1179_v46, %v1132_v10  ;;  %v1052_v53 = vadd.f32 %v1036_v63, %v1020_v56  ;;  %v956_v12 = vmul.f32 %v2111_v36, %v892_v61  ;;  %v989_v15 = vmul.f32 %v2122_v13, %v845_v51 }
 0x106   :  { %v1133_v33 = vadd.f32 %v1117_v7, %v1101_v49  ;;  %v1005_v1 = vmul.f32 %v2086_v41, %v2349_v34  ;;  %v1037_v28 = vmul.f32 %v2096_v31, %v893_v40  ;;  %v940_v24 = vadd.f32 %v924_v62, %v908_v48 }
 0x107   :  { %1228 = vst [vmem:[#allocation8 + $0xd8] sm:$0xff] %v1211_v21  ;;  %v1148_v55 = vadd.f32 %v2154_v22, %v1052_v53  ;;  %v1070_v8 = vmul.f32 %v2129_v37, %v846_v17  ;;  %v1086_v18 = vmul.f32 %v2132_v16, %v2024_v30  ;;  %v1118_v61 = vmul.f32 %v2136_v27, %v894_v3 }
 0x108   :  { %v1021_v47 = vadd.f32 %v1005_v1, %v989_v15  ;;  %v909_v32 = vmul.f32 %v2105_v52, %v845_v51  ;;  %v925_v42 = vmul.f32 %v2080_v50, %v2349_v34  ;;  %v972_v57 = vadd.f32 %v956_v12, %v940_v24 }
 0x109   :  { %v1180_v54 = vadd.f32 %v1148_v55, %v971_v14  ;;  %v1102_v58 = vadd.f32 %v1086_v18, %v1070_v8  ;;  %v957_v0 = vmul.f32 %v2111_v36, %v893_v40  ;;  %v990_v25 = vmul.f32 %v2122_v13, %v846_v17 }
 0x10a   :  { %v1053_v2 = vadd.f32 %v1037_v28, %v1021_v47  ;;  %v941_v60 = vadd.f32 %v925_v42, %v909_v32  ;;  %v1006_v38 = vmul.f32 %v2086_v41, %v2024_v30  ;;  %v1038_v29 = vmul.f32 %v2096_v31, %v894_v3 }
 0x10b   :  { %v1212_v39 = vadd.f32 %v1180_v54, %v1133_v33  ;;  %v1134_v10 = vadd.f32 %v1118_v61, %v1102_v58  ;;  %v1071_v51 = vmul.f32 %v2129_v37, %v2057_v20  ;;  %v1087_v40 = vmul.f32 %v2132_v16, %v2028_v5 }
 0x10c   :  { %v1149_v34 = vadd.f32 %v2154_v22, %v1053_v2  ;;  %v973_v26 = vadd.f32 %v957_v0, %v941_v60  ;;  %v1022_v19 = vadd.f32 %v1006_v38, %v990_v25  ;;  %v1119_v6 = vmul.f32 %v2136_v27, %v2078_v9 }
 0x10d   :  { %1229 = vst [vmem:[#allocation8 + $0xe0] sm:$0xff] %v1212_v39  ;;  %v910_v35 = vmul.f32 %v2105_v52, %v846_v17  ;;  %v926_v63 = vmul.f32 %v2080_v50, %v2024_v30  ;;  %v958_v14 = vmul.f32 %v2111_v36, %v894_v3  ;;  %v1103_v7 = vadd.f32 %v1087_v40, %v1071_v51 }
 0x10e   :  { %v1181_v4 = vadd.f32 %v1149_v34, %v972_v57  ;;  %v1054_v45 = vadd.f32 %v1038_v29, %v1022_v19  ;;  %v991_v46 = vmul.f32 %v2122_v13, %v2057_v20  ;;  %v1007_v44 = vmul.f32 %v2086_v41, %v2028_v5 }
 0x10f   :  { %v942_v56 = vadd.f32 %v926_v63, %v910_v35  ;;  %v1039_v59 = vmul.f32 %v2096_v31, %v2078_v9  ;;  %v1056_v52 = vmul.f32 %v2129_v37, %v2061_v23  ;;  %v1135_v30 = vadd.f32 %v1119_v6, %v1103_v7 }
 0x110   :  { %v1213_v49 = vadd.f32 %v1181_v4, %v1134_v10  ;;  %v1150_v50 = vadd.f32 %v2154_v22, %v1054_v45  ;;  %v1072_v36 = vmul.f32 %v2132_v16, %v2020_v43  ;;  %v1023_v17 = vadd.f32 %v1007_v44, %v991_v46 }
 0x111   :  { %v1104_v20 = vmul.f32 %v2136_v27, %v2075_v11  ;;  %v974_v41 = vadd.f32 %v958_v14, %v942_v56 }
 0x112   :  { %1230 = vst [vmem:[#allocation8 + $0xe8] sm:$0xff] %v1213_v49  ;;  %v1182_v13 = vadd.f32 %v1150_v50, %v973_v26  ;;  %v1088_v5 = vadd.f32 %v1072_v36, %v1056_v52  ;;  %v1055_v3 = vadd.f32 %v1039_v59, %v1023_v17 }
 0x114   :  { %v1214_v9 = vadd.f32 %v1182_v13, %v1135_v30  ;;  %v1120_v31 = vadd.f32 %v1104_v20, %v1088_v5  ;;  %v1151_v23 = vadd.f32 %v2154_v22, %v1055_v3 }
 0x116   :  { %1231 = vst [vmem:[#allocation8 + $0xf0] sm:$0xff] %v1214_v9  ;;  %v1199_v37 = vmul.f32 0.0, %v1120_v31  ;;  %v1183_v48 = vadd.f32 %v1151_v23, %v974_v41 }
 0x118   :  { %v1215_v21 = vadd.f32 %v1199_v37, %v1183_v48 }
 0x11a   :  { %1232 = vst [vmem:[#allocation8 + $0xf8] sm:$0xff] %v1215_v21 }
 0x11b   :  { %1389 = shalt.err (!%p1386_p0)
}
 0x11c   :  { %s1390_s28 = scalar_lea.hbm %s2467_s3, 4096 }
 0x11d   :  { %p1391_p1 = scmp.ne.s32.totalorder %s2467_s3, %s1390_s28  ;;  %p1394_p2 = scmp.lt.u32.totalorder %s1390_s28, %s2467_s3 }
 0x11f   :  { %p1396_p3 = pnand %p1394_p2, %p1391_p1 }
 0x121   :  { %1399 = shalt.err (!%p1396_p3)
}
 0x122   :  { %1244 = dma.vmem_to_hbm [thread:$0]  %s1239_s24, 4096, %s2467_s3, [#allocation4], %s1410_s1, %s1410_s1, %s1411_s9  }
 0x123   :  { %1404 = dma.done.wait [#allocation4], 4096  }
 0x124   :  { %1405 = vsyncadd [#allocation4], 4294963200 }
 0x125   :  { %1248 = vsyncpa [#allocation3], 1 }
 0x126   :  { %1249 = vsyncpa [#allocation6], 1 }
 0x127   :  { %1250 = vsyncpa [#allocation4], 1 }

</bundles_post_ra>
